<compile_context>
chip_gen: v6e
topology: v6e:2x2x1
jax: 0.10.0
libtpu: 0.0.40
codegen_flags: <defaults>
</compile_context>

<pallas_src>
import functools

import jax
import jax.numpy as jnp
from jax import lax
from jax.experimental import pallas as pl
from jax.experimental.pallas import tpu as pltpu

_BN_EPS = 1e-5


def _cc_loss_kernel(yit_ref, yj_ref, loss_ref,
                    g_ref, s1i_ref, s2i_ref, s1j_ref, s2j_ref,
                    *, lambd, batch, mxu_dtype):
    """Grid axis 0 streams batch tiles; scratch holds sufficient statistics."""
    k = pl.program_id(0)

    @pl.when(k == 0)
    def _init():
        g_ref[...] = jnp.zeros_like(g_ref)
        s1i_ref[...] = jnp.zeros_like(s1i_ref)
        s2i_ref[...] = jnp.zeros_like(s2i_ref)
        s1j_ref[...] = jnp.zeros_like(s1j_ref)
        s2j_ref[...] = jnp.zeros_like(s2j_ref)

    yit = yit_ref[...].astype(jnp.float32)   # (C, TB)  -- y_i pre-transposed
    yj = yj_ref[...].astype(jnp.float32)     # (TB, C)

    # f32 per-feature sufficient statistics (single pass: sum and sum-of-sq).
    s1i_ref[...] += jnp.sum(yit, axis=1, keepdims=True)          # (C, 1)
    s2i_ref[...] += jnp.sum(yit * yit, axis=1, keepdims=True)    # (C, 1)
    s1j_ref[...] += jnp.sum(yj, axis=0, keepdims=True)           # (1, C)
    s2j_ref[...] += jnp.sum(yj * yj, axis=0, keepdims=True)      # (1, C)

    # Raw Gram accumulation on the MXU: narrow operands, f32 accumulate.
    g_ref[...] += jnp.dot(yit.astype(mxu_dtype), yj.astype(mxu_dtype),
                          preferred_element_type=jnp.float32)    # (C, C)

    @pl.when(k == pl.num_programs(0) - 1)
    def _finalize():
        inv_b = 1.0 / float(batch)

        mu_i = s1i_ref[...] * inv_b                               # (C, 1)
        var_i = s2i_ref[...] * inv_b - mu_i * mu_i                # biased var
        inv_i = lax.rsqrt(var_i + _BN_EPS)                        # (C, 1)

        mu_j = s1j_ref[...] * inv_b                               # (1, C)
        var_j = s2j_ref[...] * inv_b - mu_j * mu_j
        inv_j = lax.rsqrt(var_j + _BN_EPS)                        # (1, C)

        # c[a,b] = (G[a,b]/B - mu_i[a]*mu_j[b]) * inv_i[a] * inv_j[b]
        c = ((g_ref[...] * inv_b - mu_i * mu_j) * inv_i) * inv_j  # (C, C) f32

        # diag via a single masked reduce; everything else from sum(c*c).
        n = c.shape[0]
        row = lax.broadcasted_iota(jnp.int32, (n, n), 0)
        col = lax.broadcasted_iota(jnp.int32, (n, n), 1)
        d = jnp.sum(jnp.where(row == col, c, 0.0), axis=1, keepdims=True)

        total_sq = jnp.sum(c * c)
        diag_sq = jnp.sum(d * d)
        on_diag = jnp.sum((d - 1.0) ** 2)
        off_diag = total_sq - diag_sq

        loss_ref[0, 0] = on_diag + lambd * off_diag


def _pick_batch_tile(batch, target=512):
    """Largest multiple-of-128 divisor of `batch` <= target (lane rule for the
    transposed LHS tile), else the full batch as a single tile."""
    if batch <= target:
        return batch
    for tb in range(target, 127, -1):
        if batch % tb == 0 and tb % 128 == 0:
            return tb
    return batch


def _vmem_limit_bytes(tb, c, itemsize):
    inputs = 2 * 2 * tb * c * itemsize            # 2 inputs x double-buffer
    gram = c * c * 4
    stats = 2 * c * 128 * 4 + 2 * 8 * max(c, 128) * 4   # padded stat vectors
    est = inputs + gram + stats
    return int(max(32 * 2 ** 20, min(64 * 2 ** 20, 2 * est)))


def cross_correlation_loss(y_i, y_j, lambd, *, block_batch=None,
                           mxu_dtype=jnp.bfloat16):
    assert y_i.shape == y_j.shape and y_i.ndim == 2
    B, C = y_i.shape

    TB = block_batch if block_batch is not None else _pick_batch_tile(B)
    if B % TB != 0 or not (TB % 128 == 0 or TB == B):
        raise ValueError(f"invalid batch tile {TB} for batch {B}")
    grid = (B // TB,)

    # Pre-arrange the LHS as (C, B) so the in-kernel dot needs no transpose.
    y_i_t = y_i.T

    kernel = functools.partial(_cc_loss_kernel, lambd=float(lambd),
                               batch=B, mxu_dtype=mxu_dtype)

    out = pl.pallas_call(
        kernel,
        out_shape=jax.ShapeDtypeStruct((1, 1), jnp.float32),
        grid_spec=pltpu.PrefetchScalarGridSpec(
            num_scalar_prefetch=0,
            grid=grid,
            in_specs=[
                pl.BlockSpec((C, TB), lambda k: (0, k)),   # y_i^T tile
                pl.BlockSpec((TB, C), lambda k: (k, 0)),   # y_j tile
            ],
            out_specs=pl.BlockSpec((1, 1), lambda k: (0, 0),
                                   memory_space=pltpu.SMEM),
            scratch_shapes=[
                pltpu.VMEM((C, C), jnp.float32),   # Gram accumulator
                pltpu.VMEM((C, 1), jnp.float32),   # sum(y_i)
                pltpu.VMEM((C, 1), jnp.float32),   # sum(y_i^2)
                pltpu.VMEM((1, C), jnp.float32),   # sum(y_j)
                pltpu.VMEM((1, C), jnp.float32),   # sum(y_j^2)
            ],
        ),
        compiler_params=pltpu.CompilerParams(
            dimension_semantics=("arbitrary",),    # batch axis is a reduction
            vmem_limit_bytes=_vmem_limit_bytes(TB, C, y_i.dtype.itemsize),
        ),
    )(y_i_t, y_j)
    return out[0, 0]


def _reference(y_i, y_j, lambd):
    # pure-JAX reference (mirrors PyTorch train-mode BatchNorm1d + BT loss)
    def bn(y):
        m = jnp.mean(y, axis=0, keepdims=True)
        v = jnp.mean((y - m) ** 2, axis=0, keepdims=True)
        return (y - m) / jnp.sqrt(v + _BN_EPS)

    zi, zj = bn(y_i), bn(y_j)
    c = lax.dot_general(zi, zj, (((0,), (0,)), ((), ())),
                        precision=lax.Precision.HIGHEST) / y_i.shape[0]
    n = c.shape[0]
    eye = jnp.eye(n, dtype=bool)
    on = jnp.sum(jnp.where(eye, (c - 1.0) ** 2, 0.0))
    off = jnp.sum(jnp.where(eye, 0.0, c ** 2))
    return on + lambd * off


if __name__ == "__main__":
    batch, n_class = 512, 128     # small but lane-dense; grid of 4 batch tiles
    lambd = 0.005                 # Barlow-Twins-style off-diagonal weight

    key = jax.random.PRNGKey(0)
    k1, k2 = jax.random.split(key)
    y_i = jax.random.normal(k1, (batch, n_class), dtype=jnp.float32)
    y_j = jax.random.normal(k2, (batch, n_class), dtype=jnp.float32)

    ref = _reference(y_i, y_j, lambd)

    # Default fast path: bf16 MXU operands, f32 accumulation.
    loss_bf16 = jax.block_until_ready(
        cross_correlation_loss(y_i, y_j, lambd, block_batch=128))
    # Full-precision path to validate the streaming sufficient-stats algebra.
    loss_f32 = jax.block_until_ready(
        cross_correlation_loss(y_i, y_j, lambd, block_batch=128,
                               mxu_dtype=jnp.float32))

    assert jnp.allclose(loss_f32, ref, rtol=5e-4, atol=5e-3), (loss_f32, ref)
    assert jnp.allclose(loss_bf16, ref, rtol=3e-2, atol=3e-2), (loss_bf16, ref)

    print("KERNEL_OK")
</pallas_src>

<mosaic_0001>
module attributes {stable_mosaic.version = 11 : i64} {
  func.func @_cc_loss_kernel(%arg0: i32, %arg1: memref<128x128xf32, #tpu.memory_space<vmem>>, %arg2: memref<128x128xf32, #tpu.memory_space<vmem>>, %arg3: memref<1x1xf32, #tpu.memory_space<smem>>, %arg4: memref<128x128xf32, #tpu.memory_space<vmem>>, %arg5: memref<128x1xf32, #tpu.memory_space<vmem>>, %arg6: memref<128x1xf32, #tpu.memory_space<vmem>>, %arg7: memref<1x128xf32, #tpu.memory_space<vmem>>, %arg8: memref<1x128xf32, #tpu.memory_space<vmem>>) attributes {dimension_semantics = [#tpu.dimension_semantics<arbitrary>], iteration_bounds = array<i64: 4>, scalar_prefetch = 0 : i64, scratch_operands = 5 : i64, tpu.core_type = #tpu.core_type<tc>, window_params = [{transform_indices = @transform_0, window_bounds = array<i64: 128, 128>}, {transform_indices = @transform_1, window_bounds = array<i64: 128, 128>}, {transform_indices = @transform_2, window_bounds = array<i64: 1, 1>}]} {
    %c0_i32 = arith.constant 0 : i32
    %0 = arith.cmpi eq, %arg0, %c0_i32 : i32
    %1 = arith.extui %0 : i1 to i32
    %c0_i32_0 = arith.constant 0 : i32
    %2 = arith.cmpi ne, %1, %c0_i32_0 : i32
    scf.if %2 {
      %cst_29 = arith.constant 0.000000e+00 : f32
      %36 = vector.broadcast %cst_29 : f32 to vector<128x128xf32>
      %c0_30 = arith.constant 0 : index
      %c0_31 = arith.constant 0 : index
      %37 = vector.load %arg4[%c0_30, %c0_31] : memref<128x128xf32, #tpu.memory_space<vmem>>, vector<128x128xf32>
      tpu.vector_store %arg4[%c0_30, %c0_31], %36 {strides = array<i32>} : memref<128x128xf32, #tpu.memory_space<vmem>>, vector<128x128xf32>,
      %cst_32 = arith.constant 0.000000e+00 : f32
      %38 = vector.broadcast %cst_32 : f32 to vector<128x1xf32>
      %c0_33 = arith.constant 0 : index
      %c0_34 = arith.constant 0 : index
      %39 = vector.load %arg5[%c0_33, %c0_34] : memref<128x1xf32, #tpu.memory_space<vmem>>, vector<128x1xf32>
      tpu.vector_store %arg5[%c0_33, %c0_34], %38 {strides = array<i32>} : memref<128x1xf32, #tpu.memory_space<vmem>>, vector<128x1xf32>,
      %cst_35 = arith.constant 0.000000e+00 : f32
      %40 = vector.broadcast %cst_35 : f32 to vector<128x1xf32>
      %c0_36 = arith.constant 0 : index
      %c0_37 = arith.constant 0 : index
      %41 = vector.load %arg6[%c0_36, %c0_37] : memref<128x1xf32, #tpu.memory_space<vmem>>, vector<128x1xf32>
      tpu.vector_store %arg6[%c0_36, %c0_37], %40 {strides = array<i32>} : memref<128x1xf32, #tpu.memory_space<vmem>>, vector<128x1xf32>,
      %cst_38 = arith.constant 0.000000e+00 : f32
      %42 = vector.broadcast %cst_38 : f32 to vector<1x128xf32>
      %c0_39 = arith.constant 0 : index
      %c0_40 = arith.constant 0 : index
      %43 = vector.load %arg7[%c0_39, %c0_40] : memref<1x128xf32, #tpu.memory_space<vmem>>, vector<1x128xf32>
      tpu.vector_store %arg7[%c0_39, %c0_40], %42 {strides = array<i32>} : memref<1x128xf32, #tpu.memory_space<vmem>>, vector<1x128xf32>,
      %cst_41 = arith.constant 0.000000e+00 : f32
      %44 = vector.broadcast %cst_41 : f32 to vector<1x128xf32>
      %c0_42 = arith.constant 0 : index
      %c0_43 = arith.constant 0 : index
      %45 = vector.load %arg8[%c0_42, %c0_43] : memref<1x128xf32, #tpu.memory_space<vmem>>, vector<1x128xf32>
      tpu.vector_store %arg8[%c0_42, %c0_43], %44 {strides = array<i32>} : memref<1x128xf32, #tpu.memory_space<vmem>>, vector<1x128xf32>,
    } else {
    }
    %c0 = arith.constant 0 : index
    %c0_1 = arith.constant 0 : index
    %3 = vector.load %arg1[%c0, %c0_1] : memref<128x128xf32, #tpu.memory_space<vmem>>, vector<128x128xf32>
    %c0_2 = arith.constant 0 : index
    %c0_3 = arith.constant 0 : index
    %4 = vector.load %arg2[%c0_2, %c0_3] : memref<128x128xf32, #tpu.memory_space<vmem>>, vector<128x128xf32>
    %c0_4 = arith.constant 0 : index
    %c0_5 = arith.constant 0 : index
    %5 = vector.load %arg5[%c0_4, %c0_5] : memref<128x1xf32, #tpu.memory_space<vmem>>, vector<128x1xf32>
    %cst = arith.constant dense<0.000000e+00> : vector<128xf32>
    %6 = vector.multi_reduction <add>, %3, %cst [1] : vector<128x128xf32> to vector<128xf32>
    %7 = vector.shape_cast %6 : vector<128xf32> to vector<128x1xf32>
    %8 = arith.addf %5, %7 : vector<128x1xf32>
    %c0_6 = arith.constant 0 : index
    %c0_7 = arith.constant 0 : index
    %9 = vector.load %arg5[%c0_6, %c0_7] : memref<128x1xf32, #tpu.memory_space<vmem>>, vector<128x1xf32>
    tpu.vector_store %arg5[%c0_6, %c0_7], %8 {strides = array<i32>} : memref<128x1xf32, #tpu.memory_space<vmem>>, vector<128x1xf32>,
    %c0_8 = arith.constant 0 : index
    %c0_9 = arith.constant 0 : index
    %10 = vector.load %arg6[%c0_8, %c0_9] : memref<128x1xf32, #tpu.memory_space<vmem>>, vector<128x1xf32>
    %11 = arith.mulf %3, %3 : vector<128x128xf32>
    %cst_10 = arith.constant dense<0.000000e+00> : vector<128xf32>
    %12 = vector.multi_reduction <add>, %11, %cst_10 [1] : vector<128x128xf32> to vector<128xf32>
    %13 = vector.shape_cast %12 : vector<128xf32> to vector<128x1xf32>
    %14 = arith.addf %10, %13 : vector<128x1xf32>
    %c0_11 = arith.constant 0 : index
    %c0_12 = arith.constant 0 : index
    %15 = vector.load %arg6[%c0_11, %c0_12] : memref<128x1xf32, #tpu.memory_space<vmem>>, vector<128x1xf32>
    tpu.vector_store %arg6[%c0_11, %c0_12], %14 {strides = array<i32>} : memref<128x1xf32, #tpu.memory_space<vmem>>, vector<128x1xf32>,
    %c0_13 = arith.constant 0 : index
    %c0_14 = arith.constant 0 : index
    %16 = vector.load %arg7[%c0_13, %c0_14] : memref<1x128xf32, #tpu.memory_space<vmem>>, vector<1x128xf32>
    %cst_15 = arith.constant dense<0.000000e+00> : vector<128xf32>
    %17 = vector.multi_reduction <add>, %4, %cst_15 [0] : vector<128x128xf32> to vector<128xf32>
    %18 = vector.shape_cast %17 : vector<128xf32> to vector<1x128xf32>
    %19 = arith.addf %16, %18 : vector<1x128xf32>
    %c0_16 = arith.constant 0 : index
    %c0_17 = arith.constant 0 : index
    %20 = vector.load %arg7[%c0_16, %c0_17] : memref<1x128xf32, #tpu.memory_space<vmem>>, vector<1x128xf32>
    tpu.vector_store %arg7[%c0_16, %c0_17], %19 {strides = array<i32>} : memref<1x128xf32, #tpu.memory_space<vmem>>, vector<1x128xf32>,
    %c0_18 = arith.constant 0 : index
    %c0_19 = arith.constant 0 : index
    %21 = vector.load %arg8[%c0_18, %c0_19] : memref<1x128xf32, #tpu.memory_space<vmem>>, vector<1x128xf32>
    %22 = arith.mulf %4, %4 : vector<128x128xf32>
    %cst_20 = arith.constant dense<0.000000e+00> : vector<128xf32>
    %23 = vector.multi_reduction <add>, %22, %cst_20 [0] : vector<128x128xf32> to vector<128xf32>
    %24 = vector.shape_cast %23 : vector<128xf32> to vector<1x128xf32>
    %25 = arith.addf %21, %24 : vector<1x128xf32>
    %c0_21 = arith.constant 0 : index
    %c0_22 = arith.constant 0 : index
    %26 = vector.load %arg8[%c0_21, %c0_22] : memref<1x128xf32, #tpu.memory_space<vmem>>, vector<1x128xf32>
    tpu.vector_store %arg8[%c0_21, %c0_22], %25 {strides = array<i32>} : memref<1x128xf32, #tpu.memory_space<vmem>>, vector<1x128xf32>,
    %c0_23 = arith.constant 0 : index
    %c0_24 = arith.constant 0 : index
    %27 = vector.load %arg4[%c0_23, %c0_24] : memref<128x128xf32, #tpu.memory_space<vmem>>, vector<128x128xf32>
    %28 = arith.truncf %3 : vector<128x128xf32> to vector<128x128xbf16>
    %29 = arith.truncf %4 : vector<128x128xf32> to vector<128x128xbf16>
    %cst_25 = arith.constant dense<0.000000e+00> : vector<128x128xf32>
    %30 = tpu.matmul %28, %29, %cst_25 {dimension_numbers = #tpu.dot_dimension_numbers<[1], [0], [0], [1], [0, 0, 1, 1], [], []>} : vector<128x128xbf16>, vector<128x128xbf16>, vector<128x128xf32> -> vector<128x128xf32>
    %31 = arith.addf %27, %30 : vector<128x128xf32>
    %c0_26 = arith.constant 0 : index
    %c0_27 = arith.constant 0 : index
    %32 = vector.load %arg4[%c0_26, %c0_27] : memref<128x128xf32, #tpu.memory_space<vmem>>, vector<128x128xf32>
    tpu.vector_store %arg4[%c0_26, %c0_27], %31 {strides = array<i32>} : memref<128x128xf32, #tpu.memory_space<vmem>>, vector<128x128xf32>,
    %c3_i32 = arith.constant 3 : i32
    %33 = arith.cmpi eq, %arg0, %c3_i32 : i32
    %34 = arith.extui %33 : i1 to i32
    %c0_i32_28 = arith.constant 0 : i32
    %35 = arith.cmpi ne, %34, %c0_i32_28 : i32
    scf.if %35 {
      %c0_29 = arith.constant 0 : index
      %c0_30 = arith.constant 0 : index
      %36 = vector.load %arg5[%c0_29, %c0_30] : memref<128x1xf32, #tpu.memory_space<vmem>>, vector<128x1xf32>
      %cst_31 = arith.constant 0.001953125 : f32
      %37 = vector.broadcast %cst_31 : f32 to vector<128x1xf32>
      %38 = arith.mulf %36, %37 : vector<128x1xf32>
      %c0_32 = arith.constant 0 : index
      %c0_33 = arith.constant 0 : index
      %39 = vector.load %arg6[%c0_32, %c0_33] : memref<128x1xf32, #tpu.memory_space<vmem>>, vector<128x1xf32>
      %cst_34 = arith.constant 0.001953125 : f32
      %40 = vector.broadcast %cst_34 : f32 to vector<128x1xf32>
      %41 = arith.mulf %39, %40 : vector<128x1xf32>
      %42 = arith.mulf %38, %38 : vector<128x1xf32>
      %43 = arith.subf %41, %42 : vector<128x1xf32>
      %cst_35 = arith.constant 9.99999974E-6 : f32
      %44 = vector.broadcast %cst_35 : f32 to vector<128x1xf32>
      %45 = arith.addf %43, %44 : vector<128x1xf32>
      %46 = math.rsqrt %45 : vector<128x1xf32>
      %c0_36 = arith.constant 0 : index
      %c0_37 = arith.constant 0 : index
      %47 = vector.load %arg7[%c0_36, %c0_37] : memref<1x128xf32, #tpu.memory_space<vmem>>, vector<1x128xf32>
      %cst_38 = arith.constant 0.001953125 : f32
      %48 = vector.broadcast %cst_38 : f32 to vector<1x128xf32>
      %49 = arith.mulf %47, %48 : vector<1x128xf32>
      %c0_39 = arith.constant 0 : index
      %c0_40 = arith.constant 0 : index
      %50 = vector.load %arg8[%c0_39, %c0_40] : memref<1x128xf32, #tpu.memory_space<vmem>>, vector<1x128xf32>
      %cst_41 = arith.constant 0.001953125 : f32
      %51 = vector.broadcast %cst_41 : f32 to vector<1x128xf32>
      %52 = arith.mulf %50, %51 : vector<1x128xf32>
      %53 = arith.mulf %49, %49 : vector<1x128xf32>
      %54 = arith.subf %52, %53 : vector<1x128xf32>
      %cst_42 = arith.constant 9.99999974E-6 : f32
      %55 = vector.broadcast %cst_42 : f32 to vector<1x128xf32>
      %56 = arith.addf %54, %55 : vector<1x128xf32>
      %57 = math.rsqrt %56 : vector<1x128xf32>
      %c0_43 = arith.constant 0 : index
      %c0_44 = arith.constant 0 : index
      %58 = vector.load %arg4[%c0_43, %c0_44] : memref<128x128xf32, #tpu.memory_space<vmem>>, vector<128x128xf32>
      %cst_45 = arith.constant 0.001953125 : f32
      %59 = vector.broadcast %cst_45 : f32 to vector<128x128xf32>
      %60 = arith.mulf %58, %59 : vector<128x128xf32>
      %61 = vector.broadcast %38 : vector<128x1xf32> to vector<128x128xf32>
      %62 = vector.broadcast %49 : vector<1x128xf32> to vector<128x128xf32>
      %63 = arith.mulf %61, %62 : vector<128x128xf32>
      %64 = arith.subf %60, %63 : vector<128x128xf32>
      %65 = vector.broadcast %46 : vector<128x1xf32> to vector<128x128xf32>
      %66 = arith.mulf %64, %65 : vector<128x128xf32>
      %67 = vector.broadcast %57 : vector<1x128xf32> to vector<128x128xf32>
      %68 = arith.mulf %66, %67 : vector<128x128xf32>
      %69 = tpu.iota {dimensions = array<i32: 0>} : vector<128x128xi32>
      %70 = tpu.iota {dimensions = array<i32: 1>} : vector<128x128xi32>
      %71 = arith.cmpi eq, %69, %70 : vector<128x128xi32>
      %cst_46 = arith.constant 0.000000e+00 : f32
      %72 = vector.broadcast %cst_46 : f32 to vector<128x128xf32>
      %73 = arith.select %71, %68, %72 : vector<128x128xi1>, vector<128x128xf32>
      %cst_47 = arith.constant dense<0.000000e+00> : vector<128xf32>
      %74 = vector.multi_reduction <add>, %73, %cst_47 [1] : vector<128x128xf32> to vector<128xf32>
      %75 = vector.shape_cast %74 : vector<128xf32> to vector<128x1xf32>
      %76 = arith.mulf %68, %68 : vector<128x128xf32>
      %77 = vector.shape_cast %76 : vector<128x128xf32> to vector<1x128x128xf32>
      %cst_48 = arith.constant dense<0.000000e+00> : vector<1xf32>
      %78 = vector.multi_reduction <add>, %77, %cst_48 [1, 2] : vector<1x128x128xf32> to vector<1xf32>
      %79 = vector.shape_cast %78 : vector<1xf32> to vector<1x1x1xf32>
      %80 = vector.extract %79[0, 0, 0] : f32 from vector<1x1x1xf32>
      %81 = arith.mulf %75, %75 : vector<128x1xf32>
      %82 = vector.shape_cast %81 : vector<128x1xf32> to vector<1x128x1xf32>
      %cst_49 = arith.constant dense<0.000000e+00> : vector<1xf32>
      %83 = vector.multi_reduction <add>, %82, %cst_49 [1, 2] : vector<1x128x1xf32> to vector<1xf32>
      %84 = vector.shape_cast %83 : vector<1xf32> to vector<1x1x1xf32>
      %85 = vector.extract %84[0, 0, 0] : f32 from vector<1x1x1xf32>
      %cst_50 = arith.constant 1.000000e+00 : f32
      %86 = vector.broadcast %cst_50 : f32 to vector<128x1xf32>
      %87 = arith.subf %75, %86 : vector<128x1xf32>
      %88 = arith.mulf %87, %87 : vector<128x1xf32>
      %89 = vector.shape_cast %88 : vector<128x1xf32> to vector<1x128x1xf32>
      %cst_51 = arith.constant dense<0.000000e+00> : vector<1xf32>
      %90 = vector.multi_reduction <add>, %89, %cst_51 [1, 2] : vector<1x128x1xf32> to vector<1xf32>
      %91 = vector.shape_cast %90 : vector<1xf32> to vector<1x1x1xf32>
      %92 = vector.extract %91[0, 0, 0] : f32 from vector<1x1x1xf32>
      %93 = arith.subf %80, %85 : f32
      %cst_52 = arith.constant 5.000000e-03 : f32
      %94 = arith.mulf %cst_52, %93 : f32
      %95 = arith.addf %92, %94 : f32
      %c0_53 = arith.constant 0 : index
      %c0_54 = arith.constant 0 : index
      %96 = memref.load %arg3[%c0_53, %c0_54] : memref<1x1xf32, #tpu.memory_space<smem>>
      memref.store %95, %arg3[%c0_53, %c0_54] : memref<1x1xf32, #tpu.memory_space<smem>>
    } else {
    }
    return
  }
  func.func @transform_0(%arg0: i32) -> (i32, i32) {
    %c0_i32 = arith.constant 0 : i32
    %c0_i32_0 = arith.constant 0 : i32
    return %c0_i32, %arg0 : i32, i32
  }
  func.func @transform_1(%arg0: i32) -> (i32, i32) {
    %c0_i32 = arith.constant 0 : i32
    %c0_i32_0 = arith.constant 0 : i32
    return %arg0, %c0_i32 : i32, i32
  }
  func.func @transform_2(%arg0: i32) -> (i32, i32) {
    %c0_i32 = arith.constant 0 : i32
    %c0_i32_0 = arith.constant 0 : i32
    %c0_i32_1 = arith.constant 0 : i32
    return %c0_i32, %c0_i32_0 : i32, i32
  }
}

</mosaic_0001>

<bundles_post_ra>
// kernel: tpu_custom_call.1
= control target key start
LH: loop header
LB: loop body
LE: loop exit
PB: predicated region body
PF: predicated region fallthrough
CT: control target
= control target key end

     0   :  { %7 = vsyncpa [#allocation8], 0  ;;  %s2284_s0 = inlined_call_operand.hbm [shape: f32[128,512], index: 0, kind: input, shape index: {}]   ;;  %s2285_s1 = inlined_call_operand.hbm [shape: f32[512,128], index: 1, kind: input, shape index: {}]   ;;  %s2286_s2 = inlined_call_operand.hbm [shape: f32[1,1], index: 2, kind: output, shape index: {}]  }
   0x1   :  { %9 = vsyncpa [#allocation8 + $0x1], 0 }
   0x2   :  { %10 = vsyncpa [#allocation11], 0 }
   0x3   :  { %12 = vsyncpa [#allocation11 + $0x1], 0 }
   0x4   :  { %13 = vsyncpa [#allocation9], 0  ;;  %s1752_s9 = smov 0   ;;  %s1754_s10 = smov 0  }
   0x5   :  { %s1756_s11 = smov 0   ;;  %s1758_s12 = smov 0  }
   0x6 LB: > { %s1771_s13 = sadd.s32 4294967295, %s1727_s12   ;;  %s1774_s14 = sadd.s32 1, %s1727_s12   ;;  %s1727_s12 = sphi %s1758_s12, %s2295_s12   ;;  %s1723_s11 = sphi %s1756_s11, %s2294_s11   ;;  %s1719_s10 = sphi %s1754_s10, %s2293_s10   ;;  %s1715_s9 = sphi %s1752_s9, %s2292_s9  }
   0x7   : > { %s23_s15 = ssub.s32 %s1727_s12, %s1774_s14  ;;  %s26_s16 = sadd.s32 1, %s1723_s11 }
   0x8   : > { %p24_p0 = scmp.eq.s32.totalorder %s23_s15, 0  ;;  %p33_p1 = scmp.ne.s32.totalorder %s1723_s11, %s1719_s10 }
   0x9   : > { %p34_p2 = scmp.eq.s32.totalorder %s1727_s12, 0  ;;  %p39_p3 = scmp.ne.s32.totalorder %s1719_s10, %s1715_s9 }
   0xa   : > { %s1784_s17 = scalar_select %p24_p0, %s1723_s11, %s26_s16  }
   0xb   : > { %p35_p4 = por %p34_p2, %p33_p1  ;;  %p40_p5 = scmp.eq.s32.totalorder %s1771_s13, 0 }
   0xc   : > { %p1542_p6 = scmp.lt.s32.totalorder %s1727_s12, 4  ;;  %s1793_s19 = sand.u32 1, %s1723_s11  }
   0xd   : > { %p1788_p7 = por %p40_p5, %p39_p3  ;;  %s1426_s20 = sshll.u32 %s1793_s19, 7 }
   0xe   : > { %s1427_s21 = sshll.u32 %s1727_s12, 7  ;;  %s114_s25 = scalar_lea.vmem [#allocation7], %s1426_s20 }
   0xf   : > { %s2288_s18 = scalar_select %p1788_p7, 1, 0 }
  0x10   : > { %s1800_s24 = scalar_lea.hbm %s2284_s0, %s1427_s21  ;;  %s120_s26 = sshll.u32 %s114_s25, 4  ;;  %s1804_s26 = int_to_ptr.vmem [resolvable:$true] %s120_s26 }
  0x11   : > { %p1806_p8 = pnand %p1542_p6, %p35_p4  ;;  %s111_s28 = scalar_lea.sflag [#allocation8], %s1793_s19 }
  0x12   : > { %s1619_s29 = scalar_lea.hbm %s1800_s24, 2048  ;;  %s1624_s4 = scalar_lea.hbm %s2284_s0, 8192 }
  0x13   : > { %p1620_p9 = scmp.ne.s32.totalorder %s1800_s24, %s1619_s29  ;;  %p1621_p10 = pneg %p1806_p8 }
  0x14   : > { %p1625_p13 = scmp.lt.s32.totalorder %s1800_s24, %s2284_s0  ;;  %p1626_p0 = scmp.lt.s32.totalorder %s1624_s4, %s1619_s29 }
  0x15   : > { %p1622_p11 = pnand %p1621_p10, %p1620_p9 }
  0x16   : > { %p1627_p1 = por %p1626_p0, %p1625_p13 }
  0x17   : > { %p1623_p12 = pneg %p1622_p11 }
  0x19   : > { %p1628_p2 = pnand %p1627_p1, %p1623_p12 }
  0x1b   : > { %1631 = shalt.err (!%p1628_p2)
}
  0x1c   : > { %s1632_s7 = scalar_lea.vmem %s1804_s26, 2048  ;;  %s1729_s8 = smov [#allocation7]  }
  0x1d   : > { %p1633_p3 = scmp.ne.s32.totalorder %s1804_s26, %s1632_s7  ;;  %s1637_s9 = sshll.u32 %s1729_s8, 4  ;;  %s1638_s9 = int_to_ptr.vmem [resolvable:$false] %s1637_s9 }
  0x1e   : > { %s1639_s15 = scalar_lea.vmem %s1638_s9, 4096  ;;  %p1640_p6 = scmp.lt.s32.totalorder %s1804_s26, %s1638_s9 }
  0x1f   : > { %p1635_p4 = pnand %p1633_p3, %p1621_p10  ;;  %p1641_p9 = scmp.lt.s32.totalorder %s1639_s15, %s1632_s7 }
  0x21   : > { %p1636_p5 = pneg %p1635_p4  ;;  %p1642_p11 = por %p1641_p9, %p1640_p6 }
  0x23   : > { %p1643_p13 = pnand %p1642_p11, %p1636_p5 }
  0x25   : > { %1646 = shalt.err (!%p1643_p13)
}
  0x26   : > { %s1730_s16 = smov 512   ;;  %s1731_s21 = smov 128  }
  0x27   : > { %s1732_s22 = smov 8   ;;  %p1431_p12 = scmp.ge.s32.totalorder %s1727_s12, 1 }
  0x28   : > { %1538 = dma.hbm_to_vmem [thread:$0]  (!%p1806_p8), %s1800_s24, 2048, %s1804_s26, %s111_s28, %s1730_s16, %s1731_s21, %s1732_s22  }
  0x29   : > { %p149_p0 = scmp.lt.s32.totalorder %s1727_s12, 5  ;;  %s1456_s25 = sshll.u32 %s1727_s12, 11 }
  0x2a   : > { %s1849_s3 = scalar_lea.hbm %s2285_s1, %s1456_s25  ;;  %s134_s4 = scalar_lea.vmem [#allocation10], %s1426_s20 }
  0x2b   : > { %p1841_p1 = pnand %p1431_p12, %p149_p0  ;;  %s141_s5 = sshll.u32 %s134_s4, 4  ;;  %s1853_s5 = int_to_ptr.vmem [resolvable:$true] %s141_s5 }
  0x2c   : > { %s131_s24 = scalar_lea.sflag [#allocation11], %s1793_s19  ;;  %s1647_s26 = scalar_lea.hbm %s1849_s3, 2048 }
  0x2d   : > { %p1648_p2 = scmp.ne.s32.totalorder %s1849_s3, %s1647_s26  ;;  %s1652_s6 = scalar_lea.hbm %s2285_s1, 8192 }
  0x2e   : > { %p1653_p5 = scmp.lt.s32.totalorder %s1849_s3, %s2285_s1  ;;  %p1654_p6 = scmp.lt.s32.totalorder %s1652_s6, %s1647_s26 }
  0x2f   : > { %p1650_p3 = pnand %p1648_p2, %p1621_p10 }
  0x30   : > { %p1655_p9 = por %p1654_p6, %p1653_p5 }
  0x31   : > { %p1651_p4 = pneg %p1650_p3 }
  0x33   : > { %p1656_p11 = pnand %p1655_p9, %p1651_p4 }
  0x35   : > { %1659 = shalt.err (!%p1656_p11)
}
  0x36   : > { %s1660_s19 = scalar_lea.vmem %s1853_s5, 2048  ;;  %s1733_s20 = smov [#allocation10]  }
  0x37   : > { %p1661_p13 = scmp.ne.s32.totalorder %s1853_s5, %s1660_s19  ;;  %s1665_s9 = sshll.u32 %s1733_s20, 4  ;;  %s1666_s9 = int_to_ptr.vmem [resolvable:$false] %s1665_s9 }
  0x38   : > { %s1667_s15 = scalar_lea.vmem %s1666_s9, 4096  ;;  %p1668_p2 = scmp.lt.s32.totalorder %s1853_s5, %s1666_s9 }
  0x39   : > { %p1663_p12 = pnand %p1661_p13, %p1621_p10  ;;  %p1669_p3 = scmp.lt.s32.totalorder %s1667_s15, %s1660_s19 }
  0x3b   : > { %p1664_p0 = pneg %p1663_p12  ;;  %p1670_p7 = por %p1669_p3, %p1668_p2 }
  0x3d   : > { %p1671_p5 = pnand %p1670_p7, %p1664_p0 }
  0x3f   : > { %1674 = shalt.err (!%p1671_p5)
}
  0x40   : > { %1541 = dma.hbm_to_vmem [thread:$0]  (!%p1806_p8), %s1849_s3, 2048, %s1853_s5, %s131_s24, %s1731_s21, %s1731_s21, %s1732_s22  }
  0x41   : > { %153 = sbr.rel (%p1841_p1) target bundleno = 912 (0x390), region = 28  ;;  %s155_s16 = sand.u32 (!%p1841_p1), 1, %s1719_s10  }
  0x42   : > { %s1432_s25 = sshll.u32 (!%p1841_p1), %s155_s16, 7  ;;  %s156_s29 = scalar_lea.sflag (!%p1841_p1), [#allocation8], %s155_s16 }
  0x43   : > { %s1884_s30 = scalar_lea.vmem (!%p1841_p1), [#allocation7], %s1432_s25  ;;  %p2291_p7 = scmp.ne.s32.totalorder (!%p1841_p1), %s2288_s18, 0 }
  0x46   : > { %1702 = dma.done.wait (%p2291_p7), %s156_s29, 2048  }
  0x47   : > { %1704 = vsyncadd (%p2291_p7), %s156_s29, 4294965248  ;;  %s165_s27 = scalar_lea.sflag [#allocation11], %s155_s16  ;;  %s1890_s4 = scalar_lea.vmem [#allocation10], %s1432_s25 }
  0x48   : > { %1706 = dma.done.wait (%p2291_p7), %s165_s27, 2048  }
  0x49   : > { %1708 = vsyncadd (%p2291_p7), %s165_s27, 4294965248  ;;  %p1434_p8 = scmp.ne.s32.totalorder %s1771_s13, 0 }
  0x4b   : > { %194 = sbr.rel (%p1434_p8) target bundleno = 106 (0x6a), region = 40 }
  0x50   : > { %vm211_vm0 = vcmask 7168   ;;  %v1734_v0 = vmov 0.0  }
  0x51   : > { %195 = vst [vmem:[#allocation2 + $0x30] sm:$0xff] %v1734_v0  ;;  %196 = vst [vmem:[#allocation2] sm:$0xff] %v1734_v0 }
  0x52   : > { %197 = vst [vmem:[#allocation2 + $0x58] sm:$0xff] %v1734_v0  ;;  %198 = vst [vmem:[#allocation2 + $0x18] sm:$0xff] %v1734_v0 }
  0x53   : > { %199 = vst [vmem:[#allocation2 + $0x50] sm:$0xff] %v1734_v0  ;;  %200 = vst [vmem:[#allocation2 + $0x68] sm:$0xff] %v1734_v0 }
  0x54   : > { %201 = vst [vmem:[#allocation2 + $0x8] sm:$0xff] %v1734_v0  ;;  %202 = vst [vmem:[#allocation2 + $0x48] sm:$0xff] %v1734_v0 }
  0x55   : > { %203 = vst [vmem:[#allocation2 + $0x40] sm:$0xff] %v1734_v0  ;;  %204 = vst [vmem:[#allocation2 + $0x20] sm:$0xff] %v1734_v0 }
  0x56   : > { %205 = vst [vmem:[#allocation2 + $0x10] sm:$0xff] %v1734_v0  ;;  %206 = vst [vmem:[#allocation2 + $0x38] sm:$0xff] %v1734_v0 }
  0x57   : > { %207 = vst [vmem:[#allocation2 + $0x60] sm:$0xff] %v1734_v0  ;;  %208 = vst [vmem:[#allocation2 + $0x70] sm:$0xff] %v1734_v0 }
  0x58   : > { %209 = vst [vmem:[#allocation2 + $0x78] sm:$0xff] %v1734_v0  ;;  %210 = vst [vmem:[#allocation2 + $0x28] sm:$0xff] %v1734_v0 }
  0x59   : > { %244 = vst [vmem:[#allocation5] sm:$0x1] %v1734_v0  ;;  %245 = vst [vmem:[#allocation6] sm:$0x1] %v1734_v0 }
  0x5a   : > { %212 = vst.msk [vmem:[#allocation3] sm:$0xff] %vm211_vm0, %v1734_v0  ;;  %213 = vst.msk [vmem:[#allocation3 + $0x8] sm:$0xff] %vm211_vm0, %v1734_v0 }
  0x5b   : > { %214 = vst.msk [vmem:[#allocation3 + $0x10] sm:$0xff] %vm211_vm0, %v1734_v0  ;;  %215 = vst.msk [vmem:[#allocation3 + $0x18] sm:$0xff] %vm211_vm0, %v1734_v0 }
  0x5c   : > { %216 = vst.msk [vmem:[#allocation3 + $0x20] sm:$0xff] %vm211_vm0, %v1734_v0  ;;  %217 = vst.msk [vmem:[#allocation3 + $0x28] sm:$0xff] %vm211_vm0, %v1734_v0 }
  0x5d   : > { %218 = vst.msk [vmem:[#allocation3 + $0x30] sm:$0xff] %vm211_vm0, %v1734_v0  ;;  %219 = vst.msk [vmem:[#allocation3 + $0x38] sm:$0xff] %vm211_vm0, %v1734_v0 }
  0x5e   : > { %220 = vst.msk [vmem:[#allocation3 + $0x40] sm:$0xff] %vm211_vm0, %v1734_v0  ;;  %221 = vst.msk [vmem:[#allocation3 + $0x48] sm:$0xff] %vm211_vm0, %v1734_v0 }
  0x5f   : > { %222 = vst.msk [vmem:[#allocation3 + $0x50] sm:$0xff] %vm211_vm0, %v1734_v0  ;;  %223 = vst.msk [vmem:[#allocation3 + $0x58] sm:$0xff] %vm211_vm0, %v1734_v0 }
  0x60   : > { %224 = vst.msk [vmem:[#allocation3 + $0x60] sm:$0xff] %vm211_vm0, %v1734_v0  ;;  %225 = vst.msk [vmem:[#allocation3 + $0x68] sm:$0xff] %vm211_vm0, %v1734_v0 }
  0x61   : > { %226 = vst.msk [vmem:[#allocation3 + $0x70] sm:$0xff] %vm211_vm0, %v1734_v0  ;;  %227 = vst.msk [vmem:[#allocation3 + $0x78] sm:$0xff] %vm211_vm0, %v1734_v0 }
  0x62   : > { %228 = vst.msk [vmem:[#allocation4] sm:$0xff] %vm211_vm0, %v1734_v0  ;;  %229 = vst.msk [vmem:[#allocation4 + $0x8] sm:$0xff] %vm211_vm0, %v1734_v0 }
  0x63   : > { %230 = vst.msk [vmem:[#allocation4 + $0x10] sm:$0xff] %vm211_vm0, %v1734_v0  ;;  %231 = vst.msk [vmem:[#allocation4 + $0x18] sm:$0xff] %vm211_vm0, %v1734_v0 }
  0x64   : > { %232 = vst.msk [vmem:[#allocation4 + $0x20] sm:$0xff] %vm211_vm0, %v1734_v0  ;;  %233 = vst.msk [vmem:[#allocation4 + $0x28] sm:$0xff] %vm211_vm0, %v1734_v0 }
  0x65   : > { %234 = vst.msk [vmem:[#allocation4 + $0x30] sm:$0xff] %vm211_vm0, %v1734_v0  ;;  %235 = vst.msk [vmem:[#allocation4 + $0x38] sm:$0xff] %vm211_vm0, %v1734_v0 }
  0x66   : > { %236 = vst.msk [vmem:[#allocation4 + $0x40] sm:$0xff] %vm211_vm0, %v1734_v0  ;;  %237 = vst.msk [vmem:[#allocation4 + $0x48] sm:$0xff] %vm211_vm0, %v1734_v0 }
  0x67   : > { %238 = vst.msk [vmem:[#allocation4 + $0x50] sm:$0xff] %vm211_vm0, %v1734_v0  ;;  %239 = vst.msk [vmem:[#allocation4 + $0x58] sm:$0xff] %vm211_vm0, %v1734_v0 }
  0x68   : > { %240 = vst.msk [vmem:[#allocation4 + $0x60] sm:$0xff] %vm211_vm0, %v1734_v0  ;;  %241 = vst.msk [vmem:[#allocation4 + $0x68] sm:$0xff] %vm211_vm0, %v1734_v0 }
  0x69   : > { %242 = vst.msk [vmem:[#allocation4 + $0x70] sm:$0xff] %vm211_vm0, %v1734_v0  ;;  %243 = vst.msk [vmem:[#allocation4 + $0x78] sm:$0xff] %vm211_vm0, %v1734_v0 }
  0x6a PF: > { %v1930_v1 = vld [vmem:[%s1890_s4 + $0x70] sm:$0xff]  ;;  %v1933_v2 = vld [vmem:[%s1890_s4 + $0x78] sm:$0xff]  ;;  %v1936_v3 = vld [vmem:[%s1890_s4 + $0x60] sm:$0xff]  ;;  %vm342_vm1 = vcmask 7168   ;;  %p1435_p10 = scmp.ne.s32.totalorder %s1771_s13, 3 }
  0x6b   : > { %v550_v4 = vpack.c.bf16 %v1933_v2, %v1930_v1  ;;  %v1941_v5 = vld [vmem:[%s1890_s4 + $0x68] sm:$0xff]  ;;  %v1946_v7 = vld [vmem:[%s1890_s4 + $0x50] sm:$0xff]  ;;  %v1949_v8 = vld [vmem:[%s1890_s4 + $0x58] sm:$0xff] }
  0x6c   : > { %v549_v6 = vpack.c.bf16 %v1941_v5, %v1936_v3  ;;  %v1952_v9 = vld [vmem:[%s1890_s4 + $0x40] sm:$0xff]  ;;  %v1955_v10 = vld [vmem:[%s1890_s4 + $0x48] sm:$0xff]  ;;  %v548_v11 = vpack.c.bf16 %v1949_v8, %v1946_v7  ;;  %v1960_v12 = vld [vmem:[%s1890_s4 + $0x10] sm:$0xff]  ;;  %v490_v61 = vmul.f32 %v1946_v7, %v1946_v7  ;;  %v491_v0 = vmul.f32 %v1949_v8, %v1949_v8 }
  0x6d   : > { %1473 = vmatprep.subr.bf16.mxu0 %v550_v4  ;;  %1505 = vmatprep.subr.bf16.mxu1 %v550_v4  ;;  %v1963_v13 = vld [vmem:[%s1890_s4] sm:$0xff]  ;;  %v1966_v14 = vld [vmem:[%s1890_s4 + $0x8] sm:$0xff]  ;;  %v482_v18 = vmul.f32 %v1960_v12, %v1960_v12  ;;  %v547_v23 = vpack.c.bf16 %v1955_v10, %v1952_v9  ;;  %v265_v24 = vld [vmem:[%s1890_s4 + $0x18] sm:$0xff]  ;;  %v488_v53 = vmul.f32 %v1952_v9, %v1952_v9 }
  0x6e   : > { %1474 = vmatpush3.bf16.msra.mxu0 %v550_v4  ;;  %1513 = vmatpush3.bf16.msra.mxu1 %v550_v4  ;;  %v1969_v15 = vld [vmem:[%s1884_s30] sm:$0xff]  ;;  %v1972_v16 = vld [vmem:[%s1884_s30 + $0x8] sm:$0xff]  ;;  %v456_v19 = vadd.f32 %v1966_v14, %v1963_v13  ;;  %v480_v20 = vmul.f32 %v1963_v13, %v1963_v13  ;;  %v481_v21 = vmul.f32 %v1966_v14, %v1966_v14  ;;  %v268_v27 = vld [vmem:[%s1890_s4 + $0x30] sm:$0xff] }
  0x6f   : > { %1475 = vmatprep.subr.bf16.mxu0 %v549_v6  ;;  %1506 = vmatprep.subr.bf16.mxu1 %v549_v6  ;;  %v1975_v17 = vld [vmem:[%s1884_s30 + $0x40] sm:$0xff]  ;;  %v1986_v22 = vld [vmem:[%s1884_s30 + $0x48] sm:$0xff]  ;;  %v535_v25 = vpack.c.bf16 %v1972_v16, %v1969_v15  ;;  %v269_v28 = vld [vmem:[%s1890_s4 + $0x38] sm:$0xff]  ;;  %v483_v29 = vmul.f32 %v265_v24, %v265_v24  ;;  %v486_v44 = vmul.f32 %v268_v27, %v268_v27 }
  0x70   : > { %294 = vadd.xlane.f32.xlu0 %v1969_v15  ;;  %v539_v26 = vpack.c.bf16 %v1986_v22, %v1975_v17  ;;  %v457_v30 = vadd.f32 %v456_v19, %v1960_v12  ;;  %v496_v31 = vadd.f32 %v481_v21, %v480_v20  ;;  %v266_v32 = vld [vmem:[%s1890_s4 + $0x20] sm:$0xff]  ;;  %v2001_v33 = vld [vmem:[%s1884_s30 + $0x10] sm:$0xff]  ;;  %v546_v37 = vpack.c.bf16 %v269_v28, %v268_v27  ;;  %v267_v38 = vld [vmem:[%s1890_s4 + $0x28] sm:$0xff] }
  0x71   : > { %1489 = vmatprep.mubr.bf16.mxu0 %v535_v25  ;;  %v484_v34 = vmul.f32 %v266_v32, %v266_v32  ;;  %298 = vadd.xlane.f32.xlu1 %v2001_v33  ;;  %v485_v39 = vmul.f32 %v267_v38, %v267_v38  ;;  %v2007_v42 = vld [vmem:[%s1884_s30 + $0x18] sm:$0xff]  ;;  %v2010_v43 = vld [vmem:[%s1884_s30 + $0x20] sm:$0xff]  ;;  %v487_v47 = vmul.f32 %v269_v28, %v269_v28  ;;  %v2015_v51 = vld [vmem:[%s1884_s30 + $0x28] sm:$0xff] }
  0x72   : > { %1476 = vmatpush3.bf16.msra.mxu0 %v549_v6  ;;  %1514 = vmatpush3.bf16.msra.mxu1 %v549_v6  ;;  %v458_v35 = vadd.f32 %v457_v30, %v265_v24  ;;  %v497_v36 = vadd.f32 %v496_v31, %v482_v18  ;;  %v545_v48 = vpack.c.bf16 %v267_v38, %v266_v32  ;;  %v2018_v52 = vld [vmem:[%s1884_s30 + $0x30] sm:$0xff]  ;;  %v2029_v60 = vld [vmem:[%s1884_s30 + $0x38] sm:$0xff]  ;;  %v2056_v20 = vld [vmem:[%s1884_s30 + $0x60] sm:$0xff] }
  0x73   : > { %1477 = vmatprep.subr.bf16.mxu0 %v548_v11  ;;  %1507 = vmatprep.subr.bf16.mxu1 %v548_v11  ;;  %v489_v56 = vmul.f32 %v1955_v10, %v1955_v10  ;;  %v544_v57 = vpack.c.bf16 %v265_v24, %v1960_v12  ;;  %v494_v21 = vmul.f32 %v1930_v1, %v1930_v1 }
  0x74   : > { %1497 = vmatprep.mubr.bf16.mxu1 %v539_v26  ;;  %296 = vadd.xlane.f32.xlu0 %v1972_v16  ;;  %v459_v40 = vadd.f32 %v458_v35, %v266_v32  ;;  %v498_v41 = vadd.f32 %v497_v36, %v483_v29  ;;  %v260_v32 = vld [vmem:[%s1884_s30 + $0x70] sm:$0xff] }
  0x75   : > { %300 = vadd.xlane.f32.xlu1 %v2007_v42 }
  0x76   : > { %1478 = vmatpush3.bf16.msra.mxu0 %v548_v11  ;;  %1515 = vmatpush3.bf16.msra.mxu1 %v548_v11  ;;  %v460_v45 = vadd.f32 %v459_v40, %v267_v38  ;;  %v499_v46 = vadd.f32 %v498_v41, %v484_v34  ;;  %v492_v11 = vmul.f32 %v1936_v3, %v1936_v3  ;;  %v261_v34 = vld [vmem:[%s1884_s30 + $0x78] sm:$0xff] }
  0x77   : > { %1479 = vmatprep.subr.bf16.mxu0 %v547_v23  ;;  %1508 = vmatprep.subr.bf16.mxu1 %v547_v23 }
  0x78   : > { %302 = vadd.xlane.f32.xlu0 %v2010_v43  ;;  %v461_v49 = vadd.f32 %v460_v45, %v268_v27  ;;  %v500_v50 = vadd.f32 %v499_v46, %v485_v39  ;;  %v542_v39 = vpack.c.bf16 %v261_v34, %v260_v32  ;;  %v377_v45 = vmul.f32 %v2001_v33, %v2001_v33 }
  0x79   : > { %304 = vadd.xlane.f32.xlu1 %v2015_v51 }
  0x7a   : > { %1480 = vmatpush3.bf16.msra.mxu0 %v547_v23  ;;  %1516 = vmatpush3.bf16.msra.mxu1 %v547_v23  ;;  %v462_v54 = vadd.f32 %v461_v49, %v269_v28  ;;  %v501_v55 = vadd.f32 %v500_v50, %v486_v44  ;;  %v536_v23 = vpack.c.bf16 %v2007_v42, %v2001_v33 }
  0x7b   : > { %1481 = vmatprep.subr.bf16.mxu0 %v546_v37  ;;  %1509 = vmatprep.subr.bf16.mxu1 %v546_v37  ;;  %v376_v44 = vmul.f32 %v1972_v16, %v1972_v16  ;;  %v378_v49 = vmul.f32 %v2007_v42, %v2007_v42  ;;  %v379_v50 = vmul.f32 %v2010_v43, %v2010_v43 }
  0x7c   : > { %306 = vadd.xlane.f32.xlu0 %v2018_v52  ;;  %v463_v58 = vadd.f32 %v462_v54, %v1952_v9  ;;  %v502_v59 = vadd.f32 %v501_v55, %v487_v47  ;;  %v543_v9 = vpack.c.bf16 %v1966_v14, %v1963_v13  ;;  %v493_v13 = vmul.f32 %v1941_v5, %v1941_v5  ;;  %v479_v55 = vld [vmem:[#allocation6] sm:$0x1] }
  0x7d   : > { %308 = vadd.xlane.f32.xlu1 %v2029_v60  ;;  %v380_v33 = vmul.f32 %v2015_v51, %v2015_v51 }
  0x7e   : > { %1482 = vmatpush3.bf16.msra.mxu0 %v546_v37  ;;  %1517 = vmatpush3.bf16.msra.mxu1 %v546_v37  ;;  %v464_v62 = vadd.f32 %v463_v58, %v1955_v10  ;;  %v503_v63 = vadd.f32 %v502_v59, %v488_v53  ;;  %v2042_v10 = vld [vmem:[%s1884_s30 + $0x50] sm:$0xff]  ;;  %v375_v37 = vmul.f32 %v1969_v15, %v1969_v15  ;;  %v455_v53 = vld [vmem:[#allocation5] sm:$0x1] }
  0x7f   : > { %1483 = vmatprep.subr.bf16.mxu0 %v545_v48  ;;  %1510 = vmatprep.subr.bf16.mxu1 %v545_v48  ;;  %v381_v58 = vmul.f32 %v2018_v52, %v2018_v52  ;;  %v383_v59 = vmul.f32 %v1975_v17, %v1975_v17 }
  0x80   : > { %310 = vadd.xlane.f32.xlu0 %v1975_v17  ;;  %v465_v4 = vadd.f32 %v464_v62, %v1946_v7  ;;  %v504_v6 = vadd.f32 %v503_v63, %v489_v56  ;;  %v2050_v7 = vld [vmem:[%s1884_s30 + $0x58] sm:$0xff]  ;;  %v389_v62 = vmul.f32 %v260_v32, %v260_v32 }
  0x81   : > { %312 = vadd.xlane.f32.xlu1 %v1986_v22  ;;  %v540_v26 = vpack.c.bf16 %v2050_v7, %v2042_v10  ;;  %v278_v63 = vld [vmem:[#allocation3] sm:$0xff] }
  0x82   : > { %1484 = vmatpush3.bf16.msra.mxu0 %v545_v48  ;;  %1518 = vmatpush3.bf16.msra.mxu1 %v545_v48  ;;  %v466_v12 = vadd.f32 %v465_v4, %v1949_v8  ;;  %v505_v18 = vadd.f32 %v504_v6, %v490_v61  ;;  %v2059_v8 = vld [vmem:[%s1884_s30 + $0x68] sm:$0xff]  ;;  %v385_v61 = vmul.f32 %v2042_v10, %v2042_v10 }
  0x83   : > { %1485 = vmatprep.subr.bf16.mxu0 %v544_v57  ;;  %1511 = vmatprep.subr.bf16.mxu1 %v544_v57  ;;  %v541_v27 = vpack.c.bf16 %v2059_v8, %v2056_v20  ;;  %v388_v17 = vmul.f32 %v2059_v8, %v2059_v8  ;;  %v280_v6 = vld [vmem:[#allocation3 + $0x10] sm:$0xff] }
  0x84   : > { %314 = vadd.xlane.f32.xlu0 %v2042_v10  ;;  %v467_v14 = vadd.f32 %v466_v12, %v1936_v3  ;;  %v506_v19 = vadd.f32 %v505_v18, %v491_v0  ;;  %v537_v3 = vpack.c.bf16 %v2015_v51, %v2010_v43  ;;  %v382_v43 = vmul.f32 %v2029_v60, %v2029_v60 }
  0x85   : > { %316 = vadd.xlane.f32.xlu1 %v2050_v7  ;;  %v384_v51 = vmul.f32 %v1986_v22, %v1986_v22  ;;  %v390_v22 = vmul.f32 %v261_v34, %v261_v34 }
  0x86   : > { %1486 = vmatpush3.bf16.msra.mxu0 %v544_v57  ;;  %1519 = vmatpush3.bf16.msra.mxu1 %v544_v57  ;;  %v468_v24 = vadd.f32 %v467_v14, %v1941_v5  ;;  %v507_v25 = vadd.f32 %v506_v19, %v492_v11  ;;  %v495_v5 = vmul.f32 %v1933_v2, %v1933_v2 }
  0x87   : > { %1487 = vmatprep.subr.bf16.mxu0 %v543_v9  ;;  %1512 = vmatprep.subr.bf16.mxu1 %v543_v9 }
  0x88   : > { %318 = vadd.xlane.f32.xlu0 %v2056_v20  ;;  %v469_v28 = vadd.f32 %v468_v24, %v1930_v1  ;;  %v508_v29 = vadd.f32 %v507_v25, %v493_v13  ;;  %v282_v13 = vld [vmem:[#allocation3 + $0x20] sm:$0xff] }
  0x89   : > { %320 = vadd.xlane.f32.xlu1 %v2059_v8 }
  0x8a   : > { %1488 = vmatpush3.bf16.msra.mxu0 %v543_v9  ;;  %1520 = vmatpush3.bf16.msra.mxu1 %v543_v9  ;;  %v470_v30 = vadd.f32 %v469_v28, %v1933_v2  ;;  %v509_v31 = vadd.f32 %v508_v29, %v494_v21  ;;  %v538_v2 = vpack.c.bf16 %v2029_v60, %v2018_v52  ;;  %v279_v9 = vld [vmem:[#allocation3 + $0x8] sm:$0xff] }
  0x8b   : > { %v386_v52 = vmul.f32 %v2050_v7, %v2050_v7  ;;  %v387_v60 = vmul.f32 %v2056_v20, %v2056_v20  ;;  %v281_v7 = vld [vmem:[#allocation3 + $0x18] sm:$0xff]  ;;  %v283_v21 = vld [vmem:[#allocation3 + $0x28] sm:$0xff] }
  0x8c   : > { %v471_v35 = vrot.slane %v470_v30, 4  ;;  %v510_v36 = vadd.f32 %v509_v31, %v495_v5  ;;  %322 = vadd.xlane.f32.xlu0 %v260_v32  ;;  %v286_v5 = vld [vmem:[#allocation3 + $0x40] sm:$0xff]  ;;  %v287_v32 = vld [vmem:[#allocation3 + $0x48] sm:$0xff] }
  0x8d   : > { %1490 = vmatmul.mubr.bf16.vlgmr.msra.gmra.mxu0 %v536_v23  ;;  %1498 = vmatmul.mubr.bf16.vlgmr.msra.gmra.mxu1 %v540_v26  ;;  %v284_v23 = vld [vmem:[#allocation3 + $0x30] sm:$0xff] }
  0x8e   : > { %1493 = vmatprep.mubr.bf16.mxu0 %v537_v3  ;;  %1501 = vmatprep.mubr.bf16.mxu1 %v541_v27  ;;  %v472_v38 = vadd.f32 %v471_v35, %v470_v30  ;;  %v511_v1 = vrot.slane %v510_v36, 4  ;;  %v285_v27 = vld [vmem:[#allocation3 + $0x38] sm:$0xff] }
  0x8f   : > { %324 = vadd.xlane.f32.xlu1 %v261_v34  ;;  %v288_v34 = vld [vmem:[#allocation3 + $0x50] sm:$0xff] }
  0x90   : > { %v473_v40 = vrot.slane %v472_v38, 2  ;;  %v512_v41 = vadd.f32 %v511_v1, %v510_v36  ;;  %391 = vadd.xlane.f32.xlu0 %v375_v37  ;;  %v289_v1 = vld [vmem:[#allocation3 + $0x58] sm:$0xff] }
  0x92   : > { %v474_v46 = vadd.f32 %v473_v40, %v472_v38  ;;  %v513_v47 = vrot.slane %v512_v41, 2 }
  0x93   : > { %393 = vadd.xlane.f32.xlu1 %v376_v44 }
  0x94   : > { %v475_v15 = vrot.slane %v474_v46, 1  ;;  %v514_v48 = vadd.f32 %v513_v47, %v512_v41  ;;  %395 = vadd.xlane.f32.xlu0 %v377_v45  ;;  %v291_v45 = vld [vmem:[#allocation3 + $0x68] sm:$0xff] }
  0x95   : > { %1494 = vmatmul.mubr.bf16.gmra.mxu0 %v538_v2  ;;  %1502 = vmatmul.mubr.bf16.gmra.mxu1 %v542_v39  ;;  %v290_v2 = vld [vmem:[#allocation3 + $0x60] sm:$0xff] }
  0x96   : > { %v476_v16 = vadd.f32 %v475_v15, %v474_v46  ;;  %v515_v54 = vrot.slane %v514_v48, 1  ;;  %v292_v46 = vld [vmem:[#allocation3 + $0x70] sm:$0xff] }
  0x97   : > { %397 = vadd.xlane.f32.xlu1 %v378_v49 }
  0x98   : > { %v477_v56 = vadd.f32 %v476_v16, %v455_v53  ;;  %v516_v57 = vadd.f32 %v515_v54, %v514_v48  ;;  %399 = vadd.xlane.f32.xlu0 %v379_v50  ;;  %v293_v50 = vld [vmem:[#allocation3 + $0x78] sm:$0xff]  ;;  %v359_v53 = vld [vmem:[#allocation4] sm:$0xff] }
  0x9a   : > { %478 = vst [vmem:[#allocation5] sm:$0x1] %v477_v56  ;;  %v517_v42 = vadd.f32 %v516_v57, %v479_v55  ;;  %v360_v56 = vld [vmem:[#allocation4 + $0x8] sm:$0xff]  ;;  %v361_v57 = vld [vmem:[#allocation4 + $0x10] sm:$0xff] }
  0x9b   : > { %401 = vadd.xlane.f32.xlu1 %v380_v33 }
  0x9c   : > { %518 = vst [vmem:[#allocation6] sm:$0x1] %v517_v42  ;;  %403 = vadd.xlane.f32.xlu0 %v381_v58 }
  0x9f   : > { %405 = vadd.xlane.f32.xlu1 %v382_v43 }
  0xa0   : > { %407 = vadd.xlane.f32.xlu0 %v383_v59 }
  0xa3   : > { %409 = vadd.xlane.f32.xlu1 %v384_v51  ;;  %v362_v51 = vld [vmem:[#allocation4 + $0x18] sm:$0xff] }
  0xa4   : > { %411 = vadd.xlane.f32.xlu0 %v385_v61  ;;  %v363_v61 = vld [vmem:[#allocation4 + $0x20] sm:$0xff] }
  0xa7   : > { %413 = vadd.xlane.f32.xlu1 %v386_v52 }
  0xa8   : > { %415 = vadd.xlane.f32.xlu0 %v387_v60 }
  0xab   : > { %417 = vadd.xlane.f32.xlu1 %v388_v17 }
  0xac   : > { %419 = vadd.xlane.f32.xlu0 %v389_v62 }
  0xaf   : > { %421 = vadd.xlane.f32.xlu1 %v390_v22  ;;  %v364_v22 = vld [vmem:[#allocation4 + $0x28] sm:$0xff] }
  0xf9   : > { %v295_v0 = vpop.xlane.xlu0 %294 }
  0xfa   : > { %v326_v4 = vadd.f32 %v295_v0, %v278_v63  ;;  %v299_v10 = vpop.xlane.xlu1 %298  ;;  %v365_v63 = vld [vmem:[#allocation4 + $0x30] sm:$0xff] }
  0xfb   : > { %v328_v12 = vadd.f32 %v299_v10, %v280_v6  ;;  %v366_v10 = vld [vmem:[#allocation4 + $0x38] sm:$0xff] }
  0xfc   : > { %343 = vst.msk [vmem:[#allocation3] sm:$0xff] %vm342_vm1, %v326_v4 }
  0xfd   : > { %v297_v11 = vpop.xlane.xlu0 %296  ;;  %345 = vst.msk [vmem:[#allocation3 + $0x10] sm:$0xff] %vm342_vm1, %v328_v12 }
  0xfe   : > { %v327_v18 = vadd.f32 %v297_v11, %v279_v9  ;;  %v301_v14 = vpop.xlane.xlu1 %300  ;;  %v367_v11 = vld [vmem:[#allocation4 + $0x40] sm:$0xff] }
  0xff   : > { %v329_v20 = vadd.f32 %v301_v14, %v281_v7  ;;  %v368_v14 = vld [vmem:[#allocation4 + $0x48] sm:$0xff] }
 0x100   : > { %344 = vst.msk [vmem:[#allocation3 + $0x8] sm:$0xff] %vm342_vm1, %v327_v18 }
 0x101   : > { %v303_v19 = vpop.xlane.xlu0 %302  ;;  %346 = vst.msk [vmem:[#allocation3 + $0x18] sm:$0xff] %vm342_vm1, %v329_v20 }
 0x102   : > { %v330_v8 = vadd.f32 %v303_v19, %v282_v13  ;;  %v305_v24 = vpop.xlane.xlu1 %304  ;;  %v369_v19 = vld [vmem:[#allocation4 + $0x50] sm:$0xff] }
 0x103   : > { %v331_v26 = vadd.f32 %v305_v24, %v283_v21  ;;  %v370_v24 = vld [vmem:[#allocation4 + $0x58] sm:$0xff] }
 0x104   : > { %347 = vst.msk [vmem:[#allocation3 + $0x20] sm:$0xff] %vm342_vm1, %v330_v8 }
 0x105   : > { %v307_v25 = vpop.xlane.xlu0 %306  ;;  %348 = vst.msk [vmem:[#allocation3 + $0x28] sm:$0xff] %vm342_vm1, %v331_v26 }
 0x106   : > { %v332_v3 = vadd.f32 %v307_v25, %v284_v23  ;;  %v309_v28 = vpop.xlane.xlu1 %308  ;;  %v371_v25 = vld [vmem:[#allocation4 + $0x60] sm:$0xff] }
 0x107   : > { %v333_v30 = vadd.f32 %v309_v28, %v285_v27  ;;  %v372_v28 = vld [vmem:[#allocation4 + $0x68] sm:$0xff] }
 0x108   : > { %349 = vst.msk [vmem:[#allocation3 + $0x30] sm:$0xff] %vm342_vm1, %v332_v3 }
 0x109   : > { %v311_v29 = vpop.xlane.xlu0 %310  ;;  %350 = vst.msk [vmem:[#allocation3 + $0x38] sm:$0xff] %vm342_vm1, %v333_v30 }
 0x10a   : > { %v334_v31 = vadd.f32 %v311_v29, %v286_v5  ;;  %v313_v35 = vpop.xlane.xlu1 %312  ;;  %v373_v29 = vld [vmem:[#allocation4 + $0x70] sm:$0xff] }
 0x10b   : > { %v335_v37 = vadd.f32 %v313_v35, %v287_v32  ;;  %v374_v35 = vld [vmem:[#allocation4 + $0x78] sm:$0xff] }
 0x10c   : > { %351 = vst.msk [vmem:[#allocation3 + $0x40] sm:$0xff] %vm342_vm1, %v334_v31 }
 0x10d   : > { %v315_v36 = vpop.xlane.xlu0 %314  ;;  %352 = vst.msk [vmem:[#allocation3 + $0x48] sm:$0xff] %vm342_vm1, %v335_v37 }
 0x10e   : > { %v336_v38 = vadd.f32 %v315_v36, %v288_v34  ;;  %v317_v39 = vpop.xlane.xlu1 %316 }
 0x10f   : > { %v337_v41 = vadd.f32 %v317_v39, %v289_v1  ;;  %v529_v1 = vld [vmem:[#allocation2 + $0x10] sm:$0xff] }
 0x110   : > { %353 = vst.msk [vmem:[#allocation3 + $0x50] sm:$0xff] %vm342_vm1, %v336_v38  ;;  %v521_v38 = vld [vmem:[#allocation2 + $0x58] sm:$0xff] }
 0x111   : > { %v319_v40 = vpop.xlane.xlu0 %318  ;;  %354 = vst.msk [vmem:[#allocation3 + $0x58] sm:$0xff] %vm342_vm1, %v337_v41  ;;  %v519_v41 = vld [vmem:[#allocation2 + $0x30] sm:$0xff] }
 0x112   : > { %v338_v44 = vadd.f32 %v319_v40, %v290_v2  ;;  %v321_v47 = vpop.xlane.xlu1 %320  ;;  %v527_v40 = vld [vmem:[#allocation2 + $0x40] sm:$0xff] }
 0x113   : > { %v339_v48 = vadd.f32 %v321_v47, %v291_v45 }
 0x114   : > { %355 = vst.msk [vmem:[#allocation3 + $0x60] sm:$0xff] %vm342_vm1, %v338_v44 }
 0x115   : > { %v323_v15 = vpop.xlane.xlu0 %322  ;;  %356 = vst.msk [vmem:[#allocation3 + $0x68] sm:$0xff] %vm342_vm1, %v339_v48  ;;  %v530_v48 = vld [vmem:[#allocation2 + $0x38] sm:$0xff] }
 0x116   : > { %v340_v49 = vadd.f32 %v323_v15, %v292_v46  ;;  %v522_v15 = vld [vmem:[#allocation2 + $0x18] sm:$0xff] }
 0x118   : > { %357 = vst.msk [vmem:[#allocation3 + $0x70] sm:$0xff] %vm342_vm1, %v340_v49  ;;  %v325_v16 = vpop.xlane.xlu1 %324 }
 0x119   : > { %v392_v54 = vpop.xlane.xlu0 %391  ;;  %v341_v55 = vadd.f32 %v325_v16, %v293_v50 }
 0x11a   : > { %v423_v33 = vadd.f32 %v392_v54, %v359_v53  ;;  %v528_v54 = vld [vmem:[#allocation2 + $0x20] sm:$0xff] }
 0x11b   : > { %358 = vst.msk [vmem:[#allocation3 + $0x78] sm:$0xff] %vm342_vm1, %v341_v55  ;;  %v520_v55 = vld [vmem:[#allocation2] sm:$0xff] }
 0x11c   : > { %439 = vst.msk [vmem:[#allocation4] sm:$0xff] %vm342_vm1, %v423_v33  ;;  %v394_v58 = vpop.xlane.xlu1 %393 }
 0x11d   : > { %v396_v42 = vpop.xlane.xlu0 %395  ;;  %v424_v43 = vadd.f32 %v394_v58, %v360_v56 }
 0x11e   : > { %v425_v59 = vadd.f32 %v396_v42, %v361_v57  ;;  %v525_v42 = vld [vmem:[#allocation2 + $0x8] sm:$0xff] }
 0x11f   : > { %440 = vst.msk [vmem:[#allocation4 + $0x8] sm:$0xff] %vm342_vm1, %v424_v43  ;;  %v533_v43 = vld [vmem:[#allocation2 + $0x78] sm:$0xff] }
 0x120   : > { %441 = vst.msk [vmem:[#allocation4 + $0x10] sm:$0xff] %vm342_vm1, %v425_v59  ;;  %v398_v52 = vpop.xlane.xlu1 %397 }
 0x121   : > { %v400_v60 = vpop.xlane.xlu0 %399  ;;  %v426_v17 = vadd.f32 %v398_v52, %v362_v51 }
 0x122   : > { %v427_v62 = vadd.f32 %v400_v60, %v363_v61  ;;  %v531_v60 = vld [vmem:[#allocation2 + $0x60] sm:$0xff] }
 0x123   : > { %442 = vst.msk [vmem:[#allocation4 + $0x18] sm:$0xff] %vm342_vm1, %v426_v17  ;;  %v523_v17 = vld [vmem:[#allocation2 + $0x50] sm:$0xff] }
 0x124   : > { %443 = vst.msk [vmem:[#allocation4 + $0x20] sm:$0xff] %vm342_vm1, %v427_v62  ;;  %v402_v0 = vpop.xlane.xlu1 %401 }
 0x125   : > { %v404_v4 = vpop.xlane.xlu0 %403  ;;  %v428_v6 = vadd.f32 %v402_v0, %v364_v22 }
 0x126   : > { %v429_v9 = vadd.f32 %v404_v4, %v365_v63  ;;  %v526_v4 = vld [vmem:[#allocation2 + $0x48] sm:$0xff] }
 0x127   : > { %444 = vst.msk [vmem:[#allocation4 + $0x28] sm:$0xff] %vm342_vm1, %v428_v6  ;;  %v534_v6 = vld [vmem:[#allocation2 + $0x28] sm:$0xff] }
 0x128   : > { %445 = vst.msk [vmem:[#allocation4 + $0x30] sm:$0xff] %vm342_vm1, %v429_v9  ;;  %v406_v12 = vpop.xlane.xlu1 %405 }
 0x129   : > { %v408_v18 = vpop.xlane.xlu0 %407  ;;  %v430_v7 = vadd.f32 %v406_v12, %v366_v10 }
 0x12a   : > { %v431_v13 = vadd.f32 %v408_v18, %v367_v11  ;;  %v532_v18 = vld [vmem:[#allocation2 + $0x70] sm:$0xff] }
 0x12b   : > { %446 = vst.msk [vmem:[#allocation4 + $0x38] sm:$0xff] %vm342_vm1, %v430_v7  ;;  %v524_v7 = vld [vmem:[#allocation2 + $0x68] sm:$0xff] }
 0x12c   : > { %447 = vst.msk [vmem:[#allocation4 + $0x40] sm:$0xff] %vm342_vm1, %v431_v13  ;;  %v410_v20 = vpop.xlane.xlu1 %409 }
 0x12d   : > { %v412_v8 = vpop.xlane.xlu0 %411  ;;  %v432_v21 = vadd.f32 %v410_v20, %v368_v14 }
 0x12e   : > { %v433_v23 = vadd.f32 %v412_v8, %v369_v19 }
 0x12f   : > { %448 = vst.msk [vmem:[#allocation4 + $0x48] sm:$0xff] %vm342_vm1, %v432_v21 }
 0x130   : > { %449 = vst.msk [vmem:[#allocation4 + $0x50] sm:$0xff] %vm342_vm1, %v433_v23  ;;  %v414_v26 = vpop.xlane.xlu1 %413 }
 0x131   : > { %v416_v3 = vpop.xlane.xlu0 %415  ;;  %v434_v27 = vadd.f32 %v414_v26, %v370_v24 }
 0x132   : > { %v435_v5 = vadd.f32 %v416_v3, %v371_v25 }
 0x133   : > { %450 = vst.msk [vmem:[#allocation4 + $0x58] sm:$0xff] %vm342_vm1, %v434_v27 }
 0x134   : > { %451 = vst.msk [vmem:[#allocation4 + $0x60] sm:$0xff] %vm342_vm1, %v435_v5  ;;  %v418_v30 = vpop.xlane.xlu1 %417 }
 0x135   : > { %v420_v31 = vpop.xlane.xlu0 %419  ;;  %v436_v32 = vadd.f32 %v418_v30, %v372_v28 }
 0x136   : > { %v437_v34 = vadd.f32 %v420_v31, %v373_v29 }
 0x137   : > { %452 = vst.msk [vmem:[#allocation4 + $0x68] sm:$0xff] %vm342_vm1, %v436_v32 }
 0x138   : > { %453 = vst.msk [vmem:[#allocation4 + $0x70] sm:$0xff] %vm342_vm1, %v437_v34  ;;  %v422_v36 = vpop.xlane.xlu1 %421 }
 0x139   : > { %v438_v37 = vadd.f32 %v422_v36, %v374_v35 }
 0x13b   : > { %454 = vst.msk [vmem:[#allocation4 + $0x78] sm:$0xff] %vm342_vm1, %v438_v37 }
 0x14d   : > { %v1491_v2 = vpop.f32.mrf.mxu0  ;;  %v1499_v39 = vpop.f32.mrf.mxu1 }
 0x14e   : > { %v650_v44 = vadd.f32 %v1491_v2, %v521_v38  ;;  %v658_v45 = vadd.f32 %v1499_v39, %v529_v1 }
 0x14f   : > { %v617_v46 = vpop.f32.mrf.mxu1  ;;  %v585_v47 = vpop.f32.mrf.mxu0 }
 0x150   : > { %666 = vst [vmem:[#allocation2 + $0x58] sm:$0xff] %v650_v44  ;;  %674 = vst [vmem:[#allocation2 + $0x10] sm:$0xff] %v658_v45  ;;  %v656_v49 = vadd.f32 %v617_v46, %v527_v40  ;;  %v648_v50 = vadd.f32 %v585_v47, %v519_v41 }
 0x151   : > { %v1492_v53 = vpop.f32.mrf.mxu0  ;;  %v1500_v16 = vpop.f32.mrf.mxu1 }
 0x152   : > { %672 = vst [vmem:[#allocation2 + $0x40] sm:$0xff] %v656_v49  ;;  %664 = vst [vmem:[#allocation2 + $0x30] sm:$0xff] %v648_v50  ;;  %v651_v33 = vadd.f32 %v1492_v53, %v522_v15  ;;  %v659_v56 = vadd.f32 %v1500_v16, %v530_v48 }
 0x153   : > { %v620_v57 = vpop.f32.mrf.mxu1  ;;  %v588_v58 = vpop.f32.mrf.mxu0 }
 0x154   : > { %667 = vst [vmem:[#allocation2 + $0x18] sm:$0xff] %v651_v33  ;;  %675 = vst [vmem:[#allocation2 + $0x38] sm:$0xff] %v659_v56  ;;  %v657_v59 = vadd.f32 %v620_v57, %v528_v54  ;;  %v649_v51 = vadd.f32 %v588_v58, %v520_v55 }
 0x155   : > { %v1495_v61 = vpop.f32.mrf.mxu0  ;;  %v1503_v52 = vpop.f32.mrf.mxu1 }
 0x156   : > { %673 = vst [vmem:[#allocation2 + $0x20] sm:$0xff] %v657_v59  ;;  %665 = vst [vmem:[#allocation2] sm:$0xff] %v649_v51  ;;  %v654_v62 = vadd.f32 %v1495_v61, %v525_v42  ;;  %v662_v22 = vadd.f32 %v1503_v52, %v533_v43 }
 0x157   : > { %v633_v63 = vpop.f32.mrf.mxu1  ;;  %v601_v0 = vpop.f32.mrf.mxu0 }
 0x158   : > { %670 = vst [vmem:[#allocation2 + $0x8] sm:$0xff] %v654_v62  ;;  %678 = vst [vmem:[#allocation2 + $0x78] sm:$0xff] %v662_v22  ;;  %v660_v9 = vadd.f32 %v633_v63, %v531_v60  ;;  %v652_v10 = vadd.f32 %v601_v0, %v523_v17 }
 0x159   : > { %v1496_v11 = vpop.f32.mrf.mxu0  ;;  %v1504_v12 = vpop.f32.mrf.mxu1 }
 0x15a   : > { %676 = vst [vmem:[#allocation2 + $0x60] sm:$0xff] %v660_v9  ;;  %668 = vst [vmem:[#allocation2 + $0x50] sm:$0xff] %v652_v10  ;;  %v655_v13 = vadd.f32 %v1496_v11, %v526_v4  ;;  %v663_v14 = vadd.f32 %v1504_v12, %v534_v6  ;;  %683 = sbr.rel (%p1435_p10) target bundleno = 906 (0x38a), region = 44 }
 0x15b   : > { %v636_v19 = vpop.f32.mrf.mxu1  ;;  %v604_v20 = vpop.f32.mrf.mxu0 }
 0x15c   : > { %671 = vst [vmem:[#allocation2 + $0x48] sm:$0xff] %v655_v13  ;;  %679 = vst [vmem:[#allocation2 + $0x28] sm:$0xff] %v663_v14  ;;  %v661_v8 = vadd.f32 %v636_v19, %v532_v18  ;;  %v653_v21 = vadd.f32 %v604_v20, %v524_v7 }
 0x15e   : > { %677 = vst [vmem:[#allocation2 + $0x70] sm:$0xff] %v661_v8  ;;  %669 = vst [vmem:[#allocation2 + $0x68] sm:$0xff] %v653_v21 }
 0x15f   : > { %v684_v23 = vld [vmem:[#allocation3] sm:$0xff]  ;;  %v685_v25 = vld [vmem:[#allocation3 + $0x8] sm:$0xff]  ;;  %v1735_v26 = vmov 0   ;;  %v686_v29 = vld [vmem:[#allocation3 + $0x10] sm:$0xff] }
 0x160   : > { %v716_v24 = vld [vmem:[#allocation4] sm:$0xff]  ;;  %1583 = vset.pattern.permute.xlu0 %v1735_v26  ;;  %v700_v3 = vmul.f32 0.001953125, %v684_v23  ;;  %v701_v5 = vmul.f32 0.001953125, %v685_v25  ;;  %v717_v28 = vld [vmem:[#allocation4 + $0x8] sm:$0xff]  ;;  %1584 = vset.pattern.permute.xlu1 %v1735_v26  ;;  %v718_v30 = vld [vmem:[#allocation4 + $0x10] sm:$0xff]  ;;  %v702_v32 = vmul.f32 0.001953125, %v686_v29 }
 0x161   : > { %v732_v27 = vmul.f32 0.001953125, %v716_v24  ;;  %v733_v31 = vmul.f32 0.001953125, %v717_v28  ;;  %v734_v34 = vmul.f32 0.001953125, %v718_v30  ;;  %v687_v35 = vld [vmem:[#allocation3 + $0x18] sm:$0xff]  ;;  %v688_v38 = vld [vmem:[#allocation3 + $0x20] sm:$0xff]  ;;  %v689_v50 = vld [vmem:[#allocation3 + $0x28] sm:$0xff] }
 0x162   : > { %854 = vperm.xlu0 %1583, %v700_v3   ;;  %v748_v36 = vmul.f32 %v700_v3, %v700_v3  ;;  %v749_v37 = vmul.f32 %v701_v5, %v701_v5  ;;  %v719_v1 = vld [vmem:[#allocation4 + $0x18] sm:$0xff]  ;;  %864 = vperm.xlu1 %1584, %v702_v32   ;;  %v750_v2 = vmul.f32 %v702_v32, %v702_v32  ;;  %v703_v39 = vmul.f32 0.001953125, %v687_v35  ;;  %v720_v45 = vld [vmem:[#allocation4 + $0x20] sm:$0xff]  ;;  %v721_v33 = vld [vmem:[#allocation4 + $0x28] sm:$0xff] }
 0x163   : > { %v735_v40 = vmul.f32 0.001953125, %v719_v1  ;;  %v704_v47 = vmul.f32 0.001953125, %v688_v38  ;;  %v736_v16 = vmul.f32 0.001953125, %v720_v45  ;;  %v705_v56 = vmul.f32 0.001953125, %v689_v50  ;;  %v690_v57 = vld [vmem:[#allocation3 + $0x30] sm:$0xff]  ;;  %v691_v52 = vld [vmem:[#allocation3 + $0x38] sm:$0xff] }
 0x164   : > { %v764_v41 = vsub.f32 %v732_v27, %v748_v36  ;;  %v765_v44 = vsub.f32 %v733_v31, %v749_v37  ;;  %v766_v46 = vsub.f32 %v734_v34, %v750_v2  ;;  %v751_v15 = vmul.f32 %v703_v39, %v703_v39  ;;  %v722_v51 = vld [vmem:[#allocation4 + $0x30] sm:$0xff]  ;;  %v723_v0 = vld [vmem:[#allocation4 + $0x38] sm:$0xff]  ;;  %v692_v4 = vld [vmem:[#allocation3 + $0x40] sm:$0xff] }
 0x165   : > { %v752_v54 = vmul.f32 %v704_v47, %v704_v47  ;;  %v737_v58 = vmul.f32 0.001953125, %v721_v33  ;;  %v753_v59 = vmul.f32 %v705_v56, %v705_v56  ;;  %v706_v61 = vmul.f32 0.001953125, %v690_v57  ;;  %v724_v18 = vld [vmem:[#allocation4 + $0x40] sm:$0xff]  ;;  %v693_v7 = vld [vmem:[#allocation3 + $0x48] sm:$0xff]  ;;  %v694_v25 = vld [vmem:[#allocation3 + $0x50] sm:$0xff] }
 0x166   : > { %v780_v48 = vadd.f32 1e-05, %v764_v41  ;;  %v781_v49 = vadd.f32 1e-05, %v765_v44  ;;  %859 = vperm.xlu0 %1583, %v701_v5   ;;  %v782_v53 = vadd.f32 1e-05, %v766_v46  ;;  %v767_v55 = vsub.f32 %v735_v40, %v751_v15  ;;  %869 = vperm.xlu1 %1584, %v703_v39  }
 0x167   : > { %v768_v42 = vsub.f32 %v736_v16, %v752_v54  ;;  %v738_v60 = vmul.f32 0.001953125, %v722_v51  ;;  %v754_v17 = vmul.f32 %v706_v61, %v706_v61  ;;  %v769_v22 = vsub.f32 %v737_v58, %v753_v59  ;;  %v725_v24 = vld [vmem:[#allocation4 + $0x48] sm:$0xff]  ;;  %v695_v5 = vld [vmem:[#allocation3 + $0x58] sm:$0xff]  ;;  %v726_v31 = vld [vmem:[#allocation4 + $0x50] sm:$0xff] }
 0x168   : > { %1585 = vrsqrt.f32 %v780_v48  ;;  %v783_v43 = vadd.f32 1e-05, %v767_v55  ;;  %v707_v63 = vmul.f32 0.001953125, %v691_v52  ;;  %v739_v9 = vmul.f32 0.001953125, %v723_v0  ;;  %v698_v32 = vld [vmem:[#allocation3 + $0x70] sm:$0xff]  ;;  %v727_v37 = vld [vmem:[#allocation4 + $0x58] sm:$0xff] }
 0x169   : > { %1587 = vrsqrt.f32 %v781_v49  ;;  %v784_v62 = vadd.f32 1e-05, %v768_v42  ;;  %v770_v6 = vsub.f32 %v738_v60, %v754_v17  ;;  %v785_v10 = vadd.f32 1e-05, %v769_v22  ;;  %v730_v40 = vld [vmem:[#allocation4 + $0x70] sm:$0xff]  ;;  %v696_v44 = vld [vmem:[#allocation3 + $0x60] sm:$0xff] }
 0x16a   : > { %874 = vperm.xlu0 %1583, %v704_v47   ;;  %1589 = vrsqrt.f32 %v782_v53  ;;  %v755_v11 = vmul.f32 %v707_v63, %v707_v63  ;;  %v708_v12 = vmul.f32 0.001953125, %v692_v4  ;;  %v740_v20 = vmul.f32 0.001953125, %v724_v18  ;;  %v728_v53 = vld [vmem:[#allocation4 + $0x60] sm:$0xff]  ;;  %v697_v54 = vld [vmem:[#allocation3 + $0x68] sm:$0xff]  ;;  %v699_v51 = vld [vmem:[#allocation3 + $0x78] sm:$0xff] }
 0x16b   : > { %1591 = vrsqrt.f32 %v783_v43  ;;  %v786_v19 = vadd.f32 1e-05, %v770_v6  ;;  %v709_v23 = vmul.f32 0.001953125, %v693_v7  ;;  %v741_v3 = vmul.f32 0.001953125, %v725_v24  ;;  %v729_v43 = vld [vmem:[#allocation4 + $0x68] sm:$0xff]  ;;  %v731_v0 = vld [vmem:[#allocation4 + $0x78] sm:$0xff] }
 0x16c   : > { %1593 = vrsqrt.f32 %v784_v62  ;;  %v771_v8 = vsub.f32 %v739_v9, %v755_v11  ;;  %v756_v21 = vmul.f32 %v708_v12, %v708_v12  ;;  %v710_v27 = vmul.f32 0.001953125, %v694_v25  ;;  %v812_v24 = vld [vmem:[#allocation5] sm:$0x1] }
 0x16d   : > { %1595 = vrsqrt.f32 %v785_v10  ;;  %v757_v30 = vmul.f32 %v709_v23, %v709_v23  ;;  %v711_v35 = vmul.f32 0.001953125, %v695_v5  ;;  %v742_v36 = vmul.f32 0.001953125, %v726_v31 }
 0x16e   : > { %879 = vperm.xlu0 %1583, %v705_v56   ;;  %1597 = vrsqrt.f32 %v786_v19  ;;  %v787_v28 = vadd.f32 1e-05, %v771_v8  ;;  %v772_v29 = vsub.f32 %v740_v20, %v756_v21  ;;  %v714_v38 = vmul.f32 0.001953125, %v698_v32 }
 0x16f   : > { %v773_v2 = vsub.f32 %v741_v3, %v757_v30  ;;  %v758_v39 = vmul.f32 %v710_v27, %v710_v27  ;;  %v743_v45 = vmul.f32 0.001953125, %v727_v37  ;;  %v759_v46 = vmul.f32 %v711_v35, %v711_v35 }
 0x170   : > { %1599 = vrsqrt.f32 %v787_v28  ;;  %v788_v1 = vadd.f32 1e-05, %v772_v29  ;;  %v746_v47 = vmul.f32 0.001953125, %v730_v40  ;;  %v762_v15 = vmul.f32 %v714_v38, %v714_v38 }
 0x171   : > { %v789_v48 = vadd.f32 1e-05, %v773_v2  ;;  %v774_v49 = vsub.f32 %v742_v36, %v758_v39  ;;  %v712_v50 = vmul.f32 0.001953125, %v696_v44  ;;  %v775_v55 = vsub.f32 %v743_v45, %v759_v46  ;;  %v821_v2 = vld [vmem:[#allocation2] sm:$0xff] }
 0x172   : > { %884 = vperm.xlu0 %1583, %v706_v61   ;;  %1601 = vrsqrt.f32 %v788_v1  ;;  %v744_v33 = vmul.f32 0.001953125, %v728_v53  ;;  %v778_v56 = vsub.f32 %v746_v47, %v762_v15  ;;  %v713_v42 = vmul.f32 0.001953125, %v697_v54  ;;  %v820_v1 = vld [vmem:[#allocation2 + $0x30] sm:$0xff]  ;;  %v822_v15 = vld [vmem:[#allocation2 + $0x58] sm:$0xff] }
 0x173   : > { %1603 = vrsqrt.f32 %v789_v48  ;;  %v790_v57 = vadd.f32 1e-05, %v774_v49  ;;  %v760_v58 = vmul.f32 %v712_v50, %v712_v50  ;;  %v791_v61 = vadd.f32 1e-05, %v775_v55 }
 0x174   : > { %v745_v52 = vmul.f32 0.001953125, %v729_v43  ;;  %v794_v60 = vadd.f32 1e-05, %v778_v56  ;;  %v761_v62 = vmul.f32 %v713_v42, %v713_v42  ;;  %v715_v22 = vmul.f32 0.001953125, %v699_v51 }
 0x175   : > { %v1586_v13 = vpop.eup %1585  ;;  %1605 = vrsqrt.f32 %v790_v57  ;;  %v776_v17 = vsub.f32 %v744_v33, %v760_v58  ;;  %v747_v9 = vmul.f32 0.001953125, %v731_v0  ;;  %v813_v25 = vmul.f32 0.001953125, %v812_v24  ;;  %v823_v58 = vld [vmem:[#allocation2 + $0x18] sm:$0xff] }
 0x176   : > { %v1588_v14 = vpop.eup %1587  ;;  %972 = vperm.xlu0 %1583, %v1586_v13   ;;  %1607 = vrsqrt.f32 %v791_v61  ;;  %v777_v6 = vsub.f32 %v745_v52, %v761_v62  ;;  %v763_v10 = vmul.f32 %v715_v22, %v715_v22  ;;  %v933_v28 = vlaneseq }
 0x177   : > { %977 = vperm.xlu1 %1584, %v1588_v14   ;;  %v1590_v26 = vpop.eup %1589  ;;  %1609 = vrsqrt.f32 %v794_v60  ;;  %v792_v4 = vadd.f32 1e-05, %v776_v17  ;;  %v836_v40 = vmul.f32 0.001953125, %v820_v1  ;;  %v837_v46 = vmul.f32 0.001953125, %v821_v2 }
 0x178   : > { %v1592_v34 = vpop.eup %1591  ;;  %v779_v18 = vsub.f32 %v747_v9, %v763_v10  ;;  %v2144_v31 = vshrl.u32 %v933_v28, 7  ;;  %v2151_v48 = vand.u32 127, %v933_v28  ;;  %v838_v33 = vmul.f32 0.001953125, %v822_v15  ;;  %v828_v15 = vld [vmem:[#allocation2 + $0x40] sm:$0xff] }
 0x179   : > { %v1594_v41 = vpop.eup %1593  ;;  %1611 = vrsqrt.f32 %v792_v4  ;;  %v839_v17 = vmul.f32 0.001953125, %v823_v58 }
 0x17a   : > { %889 = vperm.xlu0 %1583, %v707_v63   ;;  %v1596_v16 = vpop.eup %1595  ;;  %v795_v13 = vadd.f32 1e-05, %v779_v18  ;;  %v1090_v53 = vadd.s32 8, %v2144_v31  ;;  %vm1107_vm2 = vcmp.eq.s32.totalorder %v2144_v31, %v2151_v48  ;;  %v1094_v28 = vadd.s32 40, %v2144_v31 }
 0x17b   : > { %982 = vperm.xlu1 %1584, %v1590_v26   ;;  %v1598_v59 = vpop.eup %1597  ;;  %v814_v26 = vld [vmem:[#allocation6] sm:$0x1] }
 0x17c   : > { %v815_v3 = vmul.f32 0.001953125, %v814_v26  ;;  %vm1108_vm3 = vcmp.eq.s32.totalorder %v1090_v53, %v2151_v48  ;;  %vm1112_vm7 = vcmp.eq.s32.totalorder %v1094_v28, %v2151_v48 }
 0x17d   : > { %v1600_v63 = vpop.eup %1599 }
 0x17e   : > { %894 = vperm.xlu0 %1583, %v708_v12   ;;  %v793_v12 = vadd.f32 1e-05, %v777_v6  ;;  %v1092_v6 = vadd.s32 24, %v2144_v31 }
 0x17f   : > { %987 = vperm.xlu1 %1584, %v1592_v34   ;;  %v1602_v11 = vpop.eup %1601  ;;  %v935_v34 = vsub.s32 0, %v2144_v31 }
 0x180   : > { %v1604_v7 = vpop.eup %1603  ;;  %1613 = vrsqrt.f32 %v793_v12  ;;  %vm1110_vm5 = vcmp.eq.s32.totalorder %v1092_v6, %v2151_v48  ;;  %v830_v6 = vld [vmem:[#allocation2 + $0x10] sm:$0xff] }
 0x181   : > { %1615 = vrsqrt.f32 %v795_v13  ;;  %v2147_v36 = vrot.slane %v813_v25, %v935_v34  ;;  %v825_v13 = vld [vmem:[#allocation2 + $0x68] sm:$0xff] }
 0x182   : > { %899 = vperm.xlu0 %1583, %v709_v23   ;;  %v1606_v14 = vpop.eup %1605 }
 0x183   : > { %992 = vperm.xlu1 %1584, %v1594_v41   ;;  %v1608_v19 = vpop.eup %1607 }
 0x184   : > { %v1610_v20 = vpop.eup %1609 }
 0x186   : > { %904 = vperm.xlu0 %1583, %v710_v27   ;;  %v1612_v8 = vpop.eup %1611  ;;  %v816_v27 = vmul.f32 %v813_v25, %v813_v25  ;;  %v841_v25 = vmul.f32 0.001953125, %v825_v13 }
 0x187   : > { %997 = vperm.xlu1 %1584, %v1596_v16  }
 0x188   : > { %v817_v5 = vsub.f32 %v815_v3, %v816_v27  ;;  %v826_v3 = vld [vmem:[#allocation2 + $0x8] sm:$0xff] }
 0x18a   : > { %909 = vperm.xlu0 %1583, %v711_v35   ;;  %v818_v29 = vadd.f32 1e-05, %v817_v5 }
 0x18b   : > { %1002 = vperm.xlu1 %1584, %v1598_v59   ;;  %v1091_v59 = vadd.s32 16, %v2144_v31 }
 0x18c   : > { %1617 = vrsqrt.f32 %v818_v29 }
 0x18d   : > { %v1614_v21 = vpop.eup %1613  ;;  %vm1109_vm4 = vcmp.eq.s32.totalorder %v1091_v59, %v2151_v48 }
 0x18e   : > { %914 = vperm.xlu0 %1583, %v712_v50   ;;  %v1616_v23 = vpop.eup %1615 }
 0x18f   : > { %1007 = vperm.xlu1 %1584, %v1600_v63   ;;  %v824_v63 = vld [vmem:[#allocation2 + $0x50] sm:$0xff] }
 0x190   : > { %v840_v18 = vmul.f32 0.001953125, %v824_v63 }
 0x192   : > { %919 = vperm.xlu0 %1583, %v713_v42  }
 0x193   : > { %1012 = vperm.xlu1 %1584, %v1602_v11  }
 0x196   : > { %924 = vperm.xlu0 %1583, %v714_v38  }
 0x197   : > { %1017 = vperm.xlu1 %1584, %v1604_v7  }
 0x199   : > { %v1618_v41 = vpop.eup %1617 }
 0x19a   : > { %929 = vperm.xlu0 %1583, %v715_v22   ;;  %v2153_v50 = vrot.slane %v1618_v41, %v935_v34 }
 0x19b   : > { %1022 = vperm.xlu1 %1584, %v1606_v14  }
 0x19e   : > { %1042 = vperm.xlu0 %1583, %v1610_v20   ;;  %v1093_v20 = vadd.s32 32, %v2144_v31 }
 0x19f   : > { %1027 = vperm.xlu1 %1584, %v1608_v19  }
 0x1a0   : > { %vm1111_vm6 = vcmp.eq.s32.totalorder %v1093_v20, %v2151_v48 }
 0x1a3   : > { %1032 = vperm.xlu1 %1584, %v1612_v8  }
 0x1a7   : > { %1037 = vperm.xlu1 %1584, %v1614_v21  }
 0x1ab   : > { %1047 = vperm.xlu1 %1584, %v1616_v23  }
 0x1dd   : > { %v855_v30 = vpop.permute.xlu0 %854  ;;  %v865_v37 = vpop.permute.xlu1 %864 }
 0x1de   : > { %v938_v39 = vmul.f32 %v2147_v36, %v855_v30  ;;  %v940_v16 = vmul.f32 %v2147_v36, %v865_v37 }
 0x1e0   : > { %v954_v49 = vsub.f32 %v836_v40, %v938_v39  ;;  %v956_v61 = vsub.f32 %v838_v33, %v940_v16  ;;  %v1095_v39 = vadd.s32 48, %v2144_v31  ;;  %v1096_v16 = vadd.s32 56, %v2144_v31 }
 0x1e1   : > { %v860_v32 = vpop.permute.xlu0 %859  ;;  %v870_v47 = vpop.permute.xlu1 %869 }
 0x1e2   : > { %v939_v44 = vmul.f32 %v2147_v36, %v860_v32  ;;  %v941_v51 = vmul.f32 %v2147_v36, %v870_v47  ;;  %vm1113_vm8 = vcmp.eq.s32.totalorder %v1095_v39, %v2151_v48  ;;  %vm1114_vm9 = vcmp.eq.s32.totalorder %v1096_v16, %v2151_v48 }
 0x1e4   : > { %v955_v54 = vsub.f32 %v837_v46, %v939_v44  ;;  %v957_v10 = vsub.f32 %v839_v17, %v941_v51  ;;  %v1097_v17 = vadd.s32 64, %v2144_v31 }
 0x1e5   : > { %v875_v35 = vpop.permute.xlu0 %874 }
 0x1e6   : > { %v942_v9 = vmul.f32 %v2147_v36, %v875_v35  ;;  %v842_v35 = vmul.f32 0.001953125, %v826_v3  ;;  %vm1115_vm10 = vcmp.eq.s32.totalorder %v1097_v17, %v2151_v48  ;;  %v1101_v17 = vadd.s32 96, %v2144_v31 }
 0x1e8   : > { %v958_v21 = vsub.f32 %v840_v18, %v942_v9  ;;  %v846_v18 = vmul.f32 0.001953125, %v830_v6  ;;  %vm1119_vm14 = vcmp.eq.s32.totalorder %v1101_v17, %v2151_v48 }
 0x1e9   : > { %v880_v38 = vpop.permute.xlu0 %879 }
 0x1ea   : > { %v943_v8 = vmul.f32 %v2147_v36, %v880_v38  ;;  %v827_v38 = vld [vmem:[#allocation2 + $0x48] sm:$0xff] }
 0x1eb   : > { %v843_v46 = vmul.f32 0.001953125, %v827_v38 }
 0x1ec   : > { %v959_v30 = vsub.f32 %v841_v25, %v943_v8 }
 0x1ed   : > { %v885_v45 = vpop.permute.xlu0 %884 }
 0x1ee   : > { %v944_v29 = vmul.f32 %v2147_v36, %v885_v45 }
 0x1f0   : > { %v960_v41 = vsub.f32 %v842_v35, %v944_v29  ;;  %v1099_v29 = vadd.s32 80, %v2144_v31 }
 0x1f1   : > { %v973_v55 = vpop.permute.xlu0 %972 }
 0x1f2   : > { %v978_v56 = vpop.permute.xlu1 %977  ;;  %v1050_v57 = vmul.f32 %v973_v55, %v954_v49  ;;  %vm1117_vm12 = vcmp.eq.s32.totalorder %v1099_v29, %v2151_v48 }
 0x1f3   : > { %v1051_v42 = vmul.f32 %v978_v56, %v955_v54 }
 0x1f4   : > { %v2161_v43 = vmul.f32 %v2153_v50, %v1050_v57  ;;  %v844_v57 = vmul.f32 0.001953125, %v828_v15 }
 0x1f5   : > { %v890_v52 = vpop.permute.xlu0 %889  ;;  %v2166_v60 = vmul.f32 %v2153_v50, %v1051_v42  ;;  %v829_v42 = vld [vmem:[#allocation2 + $0x20] sm:$0xff] }
 0x1f6   : > { %v983_v62 = vpop.permute.xlu1 %982  ;;  %v1123_v22 = vsel %vm1107_vm2, %v2161_v43, 0.0  ;;  %v945_v40 = vmul.f32 %v2147_v36, %v890_v52  ;;  %v1171_v52 = vmul.f32 %v2161_v43, %v2161_v43 }
 0x1f7   : > { %v1052_v0 = vmul.f32 %v983_v62, %v956_v61  ;;  %v1124_v4 = vsel %vm1108_vm3, %v2166_v60, 0.0  ;;  %1139 = vadd.xlane.f32.xlu0 %v1123_v22  ;;  %v1172_v61 = vmul.f32 %v2166_v60, %v2166_v60 }
 0x1f8   : > { %1141 = vadd.xlane.f32.xlu1 %v1124_v4  ;;  %v961_v55 = vsub.f32 %v843_v46, %v945_v40  ;;  %v845_v4 = vmul.f32 0.001953125, %v829_v42 }
 0x1f9   : > { %v895_v11 = vpop.permute.xlu0 %894  ;;  %v2174_v12 = vmul.f32 %v2153_v50, %v1052_v0  ;;  %v1187_v43 = vadd.f32 %v1172_v61, %v1171_v52 }
 0x1fa   : > { %v988_v7 = vpop.permute.xlu1 %987  ;;  %v946_v54 = vmul.f32 %v2147_v36, %v895_v11 }
 0x1fb   : > { %v1053_v14 = vmul.f32 %v988_v7, %v957_v10  ;;  %v1125_v19 = vsel %vm1109_vm4, %v2174_v12, 0.0  ;;  %v1173_v60 = vmul.f32 %v2174_v12, %v2174_v12  ;;  %v1098_v7 = vadd.s32 72, %v2144_v31 }
 0x1fc   : > { %1143 = vadd.xlane.f32.xlu0 %v1125_v19  ;;  %v962_v22 = vsub.f32 %v844_v57, %v946_v54 }
 0x1fd   : > { %v900_v23 = vpop.permute.xlu0 %899  ;;  %v1075_v24 = vmul.f32 %v2153_v50, %v1053_v14  ;;  %v1188_v25 = vadd.f32 %v1187_v43, %v1173_v60  ;;  %vm1116_vm11 = vcmp.eq.s32.totalorder %v1098_v7, %v2151_v48  ;;  %v1103_v60 = vadd.s32 112, %v2144_v31 }
 0x1fe   : > { %v993_v26 = vpop.permute.xlu1 %992  ;;  %v947_v62 = vmul.f32 %v2147_v36, %v900_v23 }
 0x1ff   : > { %v1054_v27 = vmul.f32 %v993_v26, %v958_v21  ;;  %v1126_v5 = vsel %vm1110_vm5, %v1075_v24, 0.0  ;;  %v1174_v13 = vmul.f32 %v1075_v24, %v1075_v24  ;;  %v831_v21 = vld [vmem:[#allocation2 + $0x38] sm:$0xff]  ;;  %vm1121_vm15 = vcmp.eq.s32.totalorder %v1103_v60, %v2151_v48 }
 0x200   : > { %1145 = vadd.xlane.f32.xlu0 %v1126_v5  ;;  %v963_v19 = vsub.f32 %v845_v4, %v947_v62  ;;  %v832_v5 = vld [vmem:[#allocation2 + $0x60] sm:$0xff]  ;;  %v847_v24 = vmul.f32 0.001953125, %v831_v21  ;;  %v835_v4 = vld [vmem:[#allocation2 + $0x28] sm:$0xff] }
 0x201   : > { %v905_v32 = vpop.permute.xlu0 %904  ;;  %v1076_v34 = vmul.f32 %v2153_v50, %v1054_v27  ;;  %v834_v27 = vld [vmem:[#allocation2 + $0x78] sm:$0xff]  ;;  %v851_v7 = vmul.f32 0.001953125, %v835_v4 }
 0x202   : > { %v998_v37 = vpop.permute.xlu1 %997  ;;  %v948_v14 = vmul.f32 %v2147_v36, %v905_v32 }
 0x203   : > { %v1055_v1 = vmul.f32 %v998_v37, %v959_v30  ;;  %v1127_v2 = vsel %vm1111_vm6, %v1076_v34, 0.0  ;;  %v1175_v12 = vmul.f32 %v1076_v34, %v1076_v34  ;;  %v1189_v30 = vadd.f32 %v1188_v25, %v1174_v13 }
 0x204   : > { %1147 = vadd.xlane.f32.xlu1 %v1127_v2  ;;  %v964_v35 = vsub.f32 %v846_v18, %v948_v14  ;;  %v850_v34 = vmul.f32 0.001953125, %v834_v27  ;;  %v848_v2 = vmul.f32 0.001953125, %v832_v5  ;;  %v1102_v13 = vadd.s32 104, %v2144_v31 }
 0x205   : > { %v910_v44 = vpop.permute.xlu0 %909  ;;  %v1077_v45 = vmul.f32 %v2153_v50, %v1055_v1  ;;  %v1190_v39 = vadd.f32 %v1189_v30, %v1175_v12  ;;  %v1104_v27 = vadd.s32 120, %v2144_v31 }
 0x206   : > { %v1003_v47 = vpop.permute.xlu1 %1002  ;;  %v949_v28 = vmul.f32 %v2147_v36, %v910_v44  ;;  %v833_v44 = vld [vmem:[#allocation2 + $0x70] sm:$0xff]  ;;  %vm1120_vm0 = vcmp.eq.s32.totalorder %v1102_v13, %v2151_v48 }
 0x207   : > { %v1056_v49 = vmul.f32 %v1003_v47, %v960_v41  ;;  %v1128_v53 = vsel %vm1112_vm7, %v1077_v45, 0.0  ;;  %v1176_v32 = vmul.f32 %v1077_v45, %v1077_v45  ;;  %v1100_v45 = vadd.s32 88, %v2144_v31 }
 0x208   : > { %1149 = vadd.xlane.f32.xlu0 %v1128_v53  ;;  %v965_v15 = vsub.f32 %v847_v24, %v949_v28  ;;  %vm1122_vm2 = vcmp.eq.s32.totalorder %v1104_v27, %v2151_v48 }
 0x209   : > { %v2192_v33 = vpop.permute.xlu0 %914  ;;  %v1078_v56 = vmul.f32 %v2153_v50, %v1056_v49  ;;  %v1191_v49 = vadd.f32 %v1190_v39, %v1176_v32  ;;  %vm1118_vm13 = vcmp.eq.s32.totalorder %v1100_v45, %v2151_v48 }
 0x20a   : > { %v1008_v58 = vpop.permute.xlu1 %1007  ;;  %v950_v53 = vmul.f32 %v2147_v36, %v2192_v33 }
 0x20b   : > { %v1057_v59 = vmul.f32 %v1008_v58, %v961_v55  ;;  %v1129_v51 = vsel %vm1113_vm8, %v1078_v56, 0.0  ;;  %v1177_v40 = vmul.f32 %v1078_v56, %v1078_v56  ;;  %v849_v56 = vmul.f32 0.001953125, %v833_v44 }
 0x20c   : > { %1151 = vadd.xlane.f32.xlu1 %v1129_v51 }
 0x20d   : > { %v920_v63 = vpop.permute.xlu0 %919  ;;  %v1079_v0 = vmul.f32 %v2153_v50, %v1057_v59  ;;  %v1192_v57 = vadd.f32 %v1191_v49, %v1177_v40 }
 0x20e   : > { %v1013_v9 = vpop.permute.xlu1 %1012  ;;  %v951_v61 = vmul.f32 %v2147_v36, %v920_v63 }
 0x20f   : > { %v1058_v10 = vmul.f32 %v1013_v9, %v962_v22  ;;  %v1130_v11 = vsel %vm1114_vm9, %v1079_v0, 0.0  ;;  %v1178_v16 = vmul.f32 %v1079_v0, %v1079_v0  ;;  %v966_v22 = vsub.f32 %v848_v2, %v950_v53 }
 0x210   : > { %1153 = vadd.xlane.f32.xlu0 %v1130_v11  ;;  %v967_v18 = vsub.f32 %v849_v56, %v951_v61 }
 0x211   : > { %v925_v20 = vpop.permute.xlu0 %924  ;;  %v1080_v8 = vmul.f32 %v2153_v50, %v1058_v10  ;;  %v1193_v62 = vadd.f32 %v1192_v57, %v1178_v16 }
 0x212   : > { %v1018_v23 = vpop.permute.xlu1 %1017  ;;  %v952_v47 = vmul.f32 %v2147_v36, %v925_v20 }
 0x213   : > { %v1059_v26 = vmul.f32 %v1018_v23, %v963_v19  ;;  %v1131_v3 = vsel %vm1115_vm10, %v1080_v8, 0.0  ;;  %v1179_v58 = vmul.f32 %v1080_v8, %v1080_v8 }
 0x214   : > { %1155 = vadd.xlane.f32.xlu1 %v1131_v3  ;;  %v968_v52 = vsub.f32 %v850_v34, %v952_v47 }
 0x215   : > { %v930_v37 = vpop.permute.xlu0 %929  ;;  %v1081_v38 = vmul.f32 %v2153_v50, %v1059_v26  ;;  %v1194_v10 = vadd.f32 %v1193_v62, %v1179_v58 }
 0x216   : > { %v1023_v1 = vpop.permute.xlu1 %1022  ;;  %v953_v14 = vmul.f32 %v2147_v36, %v930_v37 }
 0x217   : > { %v1060_v41 = vmul.f32 %v1023_v1, %v964_v35  ;;  %v1132_v46 = vsel %vm1116_vm11, %v1081_v38, 0.0  ;;  %v1180_v33 = vmul.f32 %v1081_v38, %v1081_v38 }
 0x218   : > { %1157 = vadd.xlane.f32.xlu0 %v1132_v46  ;;  %v969_v36 = vsub.f32 %v851_v7, %v953_v14 }
 0x219   : > { %v1082_v54 = vmul.f32 %v2153_v50, %v1060_v41  ;;  %v1043_v59 = vpop.permute.xlu0 %1042  ;;  %v1195_v19 = vadd.f32 %v1194_v10, %v1180_v33 }
 0x21a   : > { %v1028_v55 = vpop.permute.xlu1 %1027  ;;  %v1064_v6 = vmul.f32 %v1043_v59, %v968_v52 }
 0x21b   : > { %v1061_v42 = vmul.f32 %v1028_v55, %v965_v15  ;;  %v1133_v51 = vsel %vm1117_vm12, %v1082_v54, 0.0  ;;  %v1181_v11 = vmul.f32 %v1082_v54, %v1082_v54 }
 0x21c   : > { %1159 = vadd.xlane.f32.xlu1 %v1133_v51  ;;  %v1086_v23 = vmul.f32 %v2153_v50, %v1064_v6 }
 0x21d   : > { %v1083_v0 = vmul.f32 %v2153_v50, %v1061_v42  ;;  %v1196_v25 = vadd.f32 %v1195_v19, %v1181_v11 }
 0x21e   : > { %v1033_v9 = vpop.permute.xlu1 %1032  ;;  %v1137_v29 = vsel %vm1121_vm15, %v1086_v23, 0.0  ;;  %v1185_v38 = vmul.f32 %v1086_v23, %v1086_v23 }
 0x21f   : > { %v1062_v43 = vmul.f32 %v1033_v9, %v966_v22  ;;  %v1134_v63 = vsel %vm1118_vm13, %v1083_v0, 0.0  ;;  %v1182_v20 = vmul.f32 %v1083_v0, %v1083_v0 }
 0x220   : > { %1161 = vadd.xlane.f32.xlu0 %v1134_v63 }
 0x221   : > { %v1084_v8 = vmul.f32 %v2153_v50, %v1062_v43  ;;  %v1197_v5 = vadd.f32 %v1196_v25, %v1182_v20 }
 0x222   : > { %v1038_v21 = vpop.permute.xlu1 %1037 }
 0x223   : > { %v1063_v12 = vmul.f32 %v1038_v21, %v967_v18  ;;  %v1135_v26 = vsel %vm1119_vm14, %v1084_v8, 0.0  ;;  %v1183_v3 = vmul.f32 %v1084_v8, %v1084_v8 }
 0x224   : > { %1163 = vadd.xlane.f32.xlu1 %v1135_v26 }
 0x225   : > { %v1085_v28 = vmul.f32 %v2153_v50, %v1063_v12  ;;  %v1198_v30 = vadd.f32 %v1197_v5, %v1183_v3 }
 0x226   : > { %v1048_v24 = vpop.permute.xlu1 %1047 }
 0x227   : > { %v1065_v32 = vmul.f32 %v1048_v24, %v969_v36  ;;  %v1136_v35 = vsel %vm1120_vm0, %v1085_v28, 0.0  ;;  %v1184_v37 = vmul.f32 %v1085_v28, %v1085_v28 }
 0x228   : > { %1165 = vadd.xlane.f32.xlu0 %v1136_v35  ;;  %1167 = vadd.xlane.f32.xlu1 %v1137_v29 }
 0x229   : > { %v1087_v1 = vmul.f32 %v2153_v50, %v1065_v32  ;;  %v1199_v34 = vadd.f32 %v1198_v30, %v1184_v37 }
 0x22b   : > { %v1138_v2 = vsel %vm1122_vm2, %v1087_v1, 0.0  ;;  %v1186_v31 = vmul.f32 %v1087_v1, %v1087_v1  ;;  %v1200_v39 = vadd.f32 %v1199_v34, %v1185_v38 }
 0x22c   : > { %1169 = vadd.xlane.f32.xlu0 %v1138_v2 }
 0x22d   : > { %v1201_v40 = vadd.f32 %v1200_v39, %v1186_v31 }
 0x22f   : > { %1202 = vadd.xlane.f32.xlu1 %v1201_v40 }
 0x280   : > { %v1140_v41 = vpop.xlane.xlu0 %1139 }
 0x281   : > { %v1142_v44 = vpop.xlane.xlu1 %1141  ;;  %v1211_v47 = vmul.f32 %v1140_v41, %v1140_v41  ;;  %v1436_v49 = vadd.f32 -1.0, %v1140_v41 }
 0x282   : > { %v1212_v15 = vmul.f32 %v1142_v44, %v1142_v44  ;;  %v1437_v45 = vadd.f32 -1.0, %v1142_v44 }
 0x283   : > { %v1227_v48 = vsel %vm342_vm1, %v1211_v47, 0.0  ;;  %v1283_v57 = vmul.f32 %v1436_v49, %v1436_v49 }
 0x284   : > { %v1228_v55 = vsel %vm342_vm1, %v1212_v15, 0.0  ;;  %v1284_v56 = vmul.f32 %v1437_v45, %v1437_v45 }
 0x285   : > { %v1144_v46 = vpop.xlane.xlu0 %1143  ;;  %v1229_v52 = vadd.f32 %v1228_v55, %v1227_v48  ;;  %v1299_v0 = vsel %vm342_vm1, %v1283_v57, 0.0 }
 0x286   : > { %v1438_v16 = vadd.f32 -1.0, %v1144_v46  ;;  %v1213_v54 = vmul.f32 %v1144_v46, %v1144_v46  ;;  %v1300_v22 = vsel %vm342_vm1, %v1284_v56, 0.0 }
 0x287   : > { %v1301_v7 = vadd.f32 %v1300_v22, %v1299_v0 }
 0x288   : > { %v1285_v51 = vmul.f32 %v1438_v16, %v1438_v16  ;;  %v1230_v17 = vsel %vm342_vm1, %v1213_v54, 0.0 }
 0x289   : > { %v1146_v53 = vpop.xlane.xlu0 %1145  ;;  %v1231_v11 = vadd.f32 %v1230_v17, %v1229_v52 }
 0x28a   : > { %v1439_v58 = vadd.f32 -1.0, %v1146_v53  ;;  %v1214_v42 = vmul.f32 %v1146_v53, %v1146_v53  ;;  %v1302_v43 = vsel %vm342_vm1, %v1285_v51, 0.0 }
 0x28b   : > { %v1303_v25 = vadd.f32 %v1302_v43, %v1301_v7 }
 0x28c   : > { %v1286_v4 = vmul.f32 %v1439_v58, %v1439_v58  ;;  %v1232_v9 = vsel %vm342_vm1, %v1214_v42, 0.0 }
 0x28d   : > { %v1148_v50 = vpop.xlane.xlu1 %1147  ;;  %v1233_v20 = vadd.f32 %v1232_v9, %v1231_v11 }
 0x28e   : > { %v1440_v61 = vadd.f32 -1.0, %v1148_v50  ;;  %v1215_v62 = vmul.f32 %v1148_v50, %v1148_v50  ;;  %v1304_v8 = vsel %vm342_vm1, %v1286_v4, 0.0 }
 0x28f   : > { %v1305_v24 = vadd.f32 %v1304_v8, %v1303_v25 }
 0x290   : > { %v1287_v63 = vmul.f32 %v1440_v61, %v1440_v61  ;;  %v1234_v13 = vsel %vm342_vm1, %v1215_v62, 0.0 }
 0x291   : > { %v1150_v59 = vpop.xlane.xlu0 %1149  ;;  %v1235_v27 = vadd.f32 %v1234_v13, %v1233_v20 }
 0x292   : > { %v1441_v6 = vadd.f32 -1.0, %v1150_v59  ;;  %v1216_v60 = vmul.f32 %v1150_v59, %v1150_v59  ;;  %v1306_v5 = vsel %vm342_vm1, %v1287_v63, 0.0 }
 0x293   : > { %v1307_v34 = vadd.f32 %v1306_v5, %v1305_v24 }
 0x294   : > { %v1288_v21 = vmul.f32 %v1441_v6, %v1441_v6  ;;  %v1236_v12 = vsel %vm342_vm1, %v1216_v60, 0.0 }
 0x295   : > { %v1152_v33 = vpop.xlane.xlu1 %1151  ;;  %v1237_v32 = vadd.f32 %v1236_v12, %v1235_v27 }
 0x296   : > { %v1442_v18 = vadd.f32 -1.0, %v1152_v33  ;;  %v1217_v14 = vmul.f32 %v1152_v33, %v1152_v33  ;;  %v1308_v35 = vsel %vm342_vm1, %v1288_v21, 0.0 }
 0x297   : > { %v1309_v44 = vadd.f32 %v1308_v35, %v1307_v34 }
 0x298   : > { %v1289_v36 = vmul.f32 %v1442_v18, %v1442_v18  ;;  %v1238_v29 = vsel %vm342_vm1, %v1217_v14, 0.0 }
 0x299   : > { %v1154_v10 = vpop.xlane.xlu0 %1153  ;;  %v1239_v39 = vadd.f32 %v1238_v29, %v1237_v32 }
 0x29a   : > { %v1443_v23 = vadd.f32 -1.0, %v1154_v10  ;;  %v1218_v26 = vmul.f32 %v1154_v10, %v1154_v10  ;;  %v1310_v40 = vsel %vm342_vm1, %v1289_v36, 0.0 }
 0x29b   : > { %v1311_v48 = vadd.f32 %v1310_v40, %v1309_v44 }
 0x29c   : > { %v1290_v37 = vmul.f32 %v1443_v23, %v1443_v23  ;;  %v1240_v2 = vsel %vm342_vm1, %v1218_v26, 0.0 }
 0x29d   : > { %v1156_v19 = vpop.xlane.xlu1 %1155  ;;  %v1241_v45 = vadd.f32 %v1240_v2, %v1239_v39 }
 0x29e   : > { %v1444_v28 = vadd.f32 -1.0, %v1156_v19  ;;  %v1219_v30 = vmul.f32 %v1156_v19, %v1156_v19  ;;  %v1312_v49 = vsel %vm342_vm1, %v1290_v37, 0.0 }
 0x29f   : > { %v1313_v42 = vadd.f32 %v1312_v49, %v1311_v48 }
 0x2a0   : > { %v1291_v41 = vmul.f32 %v1444_v28, %v1444_v28  ;;  %v1242_v47 = vsel %vm342_vm1, %v1219_v30, 0.0 }
 0x2a1   : > { %v1158_v3 = vpop.xlane.xlu0 %1157  ;;  %v1243_v56 = vadd.f32 %v1242_v47, %v1241_v45 }
 0x2a2   : > { %v1445_v38 = vadd.f32 -1.0, %v1158_v3  ;;  %v1220_v31 = vmul.f32 %v1158_v3, %v1158_v3  ;;  %v1314_v57 = vsel %vm342_vm1, %v1291_v41, 0.0 }
 0x2a3   : > { %v1315_v62 = vadd.f32 %v1314_v57, %v1313_v42 }
 0x2a4   : > { %v1292_v53 = vmul.f32 %v1445_v38, %v1445_v38  ;;  %v1244_v54 = vsel %vm342_vm1, %v1220_v31, 0.0 }
 0x2a5   : > { %v1160_v1 = vpop.xlane.xlu1 %1159  ;;  %v1245_v51 = vadd.f32 %v1244_v54, %v1243_v56 }
 0x2a6   : > { %v1446_v46 = vadd.f32 -1.0, %v1160_v1  ;;  %v1221_v15 = vmul.f32 %v1160_v1, %v1160_v1  ;;  %v1316_v61 = vsel %vm342_vm1, %v1292_v53, 0.0 }
 0x2a7   : > { %v1317_v9 = vadd.f32 %v1316_v61, %v1315_v62 }
 0x2a8   : > { %v1293_v58 = vmul.f32 %v1446_v46, %v1446_v46  ;;  %v1246_v59 = vsel %vm342_vm1, %v1221_v15, 0.0 }
 0x2a9   : > { %v1162_v16 = vpop.xlane.xlu0 %1161  ;;  %v1247_v4 = vadd.f32 %v1246_v59, %v1245_v51 }
 0x2aa   : > { %v1222_v50 = vmul.f32 %v1162_v16, %v1162_v16  ;;  %v1447_v55 = vadd.f32 -1.0, %v1162_v16  ;;  %v1318_v6 = vsel %vm342_vm1, %v1293_v58, 0.0 }
 0x2ab   : > { %v1319_v7 = vadd.f32 %v1318_v6, %v1317_v9 }
 0x2ac   : > { %v1294_v52 = vmul.f32 %v1447_v55, %v1447_v55  ;;  %v1248_v33 = vsel %vm342_vm1, %v1222_v50, 0.0 }
 0x2ad   : > { %v1164_v17 = vpop.xlane.xlu1 %1163  ;;  %v1249_v11 = vadd.f32 %v1248_v33, %v1247_v4 }
 0x2ae   : > { %v1223_v22 = vmul.f32 %v1164_v17, %v1164_v17  ;;  %v1448_v0 = vadd.f32 -1.0, %v1164_v17  ;;  %v1320_v43 = vsel %vm342_vm1, %v1294_v52, 0.0 }
 0x2af   : > { %v1321_v23 = vadd.f32 %v1320_v43, %v1319_v7 }
 0x2b0   : > { %v1250_v60 = vsel %vm342_vm1, %v1223_v22, 0.0  ;;  %v1295_v10 = vmul.f32 %v1448_v0, %v1448_v0 }
 0x2b1   : > { %v1168_v63 = vpop.xlane.xlu1 %1167  ;;  %v1166_v18 = vpop.xlane.xlu0 %1165  ;;  %v1251_v20 = vadd.f32 %v1250_v60, %v1249_v11 }
 0x2b2   : > { %v1225_v13 = vmul.f32 %v1168_v63, %v1168_v63  ;;  %v1450_v14 = vadd.f32 -1.0, %v1168_v63  ;;  %v1224_v19 = vmul.f32 %v1166_v18, %v1166_v18  ;;  %v1322_v8 = vsel %vm342_vm1, %v1295_v10, 0.0 }
 0x2b3   : > { %v1449_v21 = vadd.f32 -1.0, %v1166_v18  ;;  %v1323_v5 = vadd.f32 %v1322_v8, %v1321_v23 }
 0x2b4   : > { %v1252_v25 = vsel %vm342_vm1, %v1224_v19, 0.0  ;;  %v1297_v12 = vmul.f32 %v1450_v14, %v1450_v14  ;;  %v1254_v36 = vsel %vm342_vm1, %v1225_v13, 0.0 }
 0x2b5   : > { %v1253_v26 = vadd.f32 %v1252_v25, %v1251_v20  ;;  %v1296_v3 = vmul.f32 %v1449_v21, %v1449_v21  ;;  %v1170_v27 = vpop.xlane.xlu0 %1169 }
 0x2b6   : > { %v1226_v28 = vmul.f32 %v1170_v27, %v1170_v27  ;;  %v1451_v24 = vadd.f32 -1.0, %v1170_v27  ;;  %v1326_v1 = vsel %vm342_vm1, %v1297_v12, 0.0 }
 0x2b7   : > { %v1324_v29 = vsel %vm342_vm1, %v1296_v3, 0.0  ;;  %v1255_v30 = vadd.f32 %v1254_v36, %v1253_v26 }
 0x2b8   : > { %v1325_v32 = vadd.f32 %v1324_v29, %v1323_v5  ;;  %v1256_v35 = vsel %vm342_vm1, %v1226_v28, 0.0  ;;  %v1298_v37 = vmul.f32 %v1451_v24, %v1451_v24  ;;  %v1203_v38 = vpop.xlane.xlu1 %1202 }
 0x2b9   : > { %v1204_v34 = vrot.slane %v1203_v38, 4  ;;  %v1257_v2 = vadd.f32 %v1256_v35, %v1255_v30 }
 0x2ba   : > { %v1327_v31 = vadd.f32 %v1326_v1, %v1325_v32  ;;  %v1328_v39 = vsel %vm342_vm1, %v1298_v37, 0.0 }
 0x2bb   : > { %v1205_v40 = vadd.f32 %v1204_v34, %v1203_v38  ;;  %1258 = vadd.xlane.f32.xlu0 %v1257_v2 }
 0x2bc   : > { %v1329_v41 = vadd.f32 %v1328_v39, %v1327_v31 }
 0x2bd   : > { %v1206_v46 = vrot.slane %v1205_v40, 2 }
 0x2be   : > { %1330 = vadd.xlane.f32.xlu1 %v1329_v41 }
 0x2bf   : > { %v1207_v44 = vadd.f32 %v1206_v46, %v1205_v40 }
 0x2c1   : > { %v1208_v47 = vrot.slane %v1207_v44, 1 }
 0x2c3   : > { %v1209_v15 = vadd.f32 %v1208_v47, %v1207_v44 }
 0x2c5   : > { %1521 = vpush %v1209_v15 }
 0x2f6   : > { %s1522_s18 = spop %1521 }
 0x344   : > { %v1259_v45 = vpop.xlane.xlu0 %1258 }
 0x345   : > { %v1260_v49 = vrot.slane %v1259_v45, 4 }
 0x347   : > { %v1261_v53 = vadd.f32 %v1260_v49, %v1259_v45  ;;  %v1331_v16 = vpop.xlane.xlu1 %1330 }
 0x348   : > { %v1332_v48 = vrot.slane %v1331_v16, 4 }
 0x349   : > { %v1262_v54 = vrot.slane %v1261_v53, 2 }
 0x34a   : > { %v1333_v50 = vadd.f32 %v1332_v48, %v1331_v16 }
 0x34b   : > { %v1263_v55 = vadd.f32 %v1262_v54, %v1261_v53 }
 0x34c   : > { %v1334_v56 = vrot.slane %v1333_v50, 2 }
 0x34d   : > { %v1264_v57 = vrot.slane %v1263_v55, 1 }
 0x34e   : > { %v1335_v58 = vadd.f32 %v1334_v56, %v1333_v50 }
 0x34f   : > { %v1265_v42 = vadd.f32 %v1264_v57, %v1263_v55 }
 0x350   : > { %v1336_v59 = vrot.slane %v1335_v58, 1 }
 0x351   : > { %1523 = vpush %v1265_v42 }
 0x352   : > { %v1337_v51 = vadd.f32 %v1336_v59, %v1335_v58 }
 0x354   : > { %1525 = vpush %v1337_v51 }
 0x382   : > { %s1524_s21 = spop %1523 }
 0x383   : > { %s1339_s22 = ssub.f32 %s1522_s18, %s1524_s21 }
 0x385   : > { %s1340_s23 = smul.f32 0.005, %s1339_s22  ;;  %s1526_s3 = spop %1525 }
 0x387   : > { %s1341_s5 = sadd.f32 %s1526_s3, %s1340_s23 }
 0x389   : > { %1343 = sst [smem:[#allocation12]] %s1341_s5 }
 0x38a PF: > { %p1543_p1 = scmp.eq.s32.totalorder %s1771_s13, 3  ;;  %s1736_s24 = smov [#allocation12]  }
 0x38c   : > { %1532 = dma.smem_to_hbm (%p1543_p1), %s1736_s24, 16, %s2286_s2, [#allocation9]  }
 0x38d   : > { %1710 = dma.done.wait (%p1543_p1), [#allocation9], 16  }
 0x38e   : > { %1712 = vsyncadd (%p1543_p1), [#allocation9], 4294967280 }
 0x38f   : > { %1357 = sfence }
 0x390 PF: > { %p16_p4 = scmp.ge.s32.totalorder %s1774_s14, 6   ;;  %s2292_s9 = smov %s1719_s10 }
 0x391   : > { %s2293_s10 = smov %s1723_s11  ;;  %s2294_s11 = smov %s1784_s17 }
 0x392   : > { %s2295_s12 = smov %s1774_s14  ;;  %18 = sbr.rel (!%p16_p4) target bundleno = 6 (0x6), region = 87 }
 0x397   :  { %1363 = vsyncpa [#allocation8], 1 }
 0x398   :  { %1365 = vsyncpa [#allocation8 + $0x1], 1 }
 0x399   :  { %1366 = vsyncpa [#allocation11], 1 }
 0x39a   :  { %1368 = vsyncpa [#allocation11 + $0x1], 1 }
 0x39b   :  { %1369 = vsyncpa [#allocation9], 1 }
 0x39c   :  { %1371 = vsyncpa [#allocation9 + $0x1], 1 }

</bundles_post_ra>
